<compile_context>
chip_gen: v5e
topology: v5e:2x2
jax: 0.10.0
libtpu: 0.0.40
codegen_flags: <defaults>
</compile_context>

<pallas_src>
import math

import jax
import jax.numpy as jnp
from jax import lax
from jax.experimental import pallas as pl
from jax.experimental.pallas import tpu as pltpu


# ----------------------------------------------------------------------------
# Fused Pallas kernel: one (batch, query-row-tile) step.
# ----------------------------------------------------------------------------
def _gab_kernel(x_ref, wqkv_ref, bqkv_ref, o_ref, qkv_sc):
    r = pl.program_id(1)
    tq, C = o_ref.shape                         # output block is (tq, C)
    cqp = (wqkv_ref.shape[1] - C) // 2          # padded query/key width (128)

    # Fused Q/K/V projection for the whole batch element, once per b (r == 0).
    @pl.when(r == 0)
    def _():
        x_all = x_ref[...].astype(jnp.bfloat16)                         # [HW, C]
        qkv = jnp.dot(x_all, wqkv_ref[...],
                      preferred_element_type=jnp.float32) + bqkv_ref[...]
        qkv_sc[...] = qkv.astype(jnp.bfloat16)                          # [HW, 2*cqp+C]

    row0 = pl.multiple_of(r * tq, tq)

    q = qkv_sc[pl.ds(row0, tq), :][:, :cqp]                             # [tq, cqp] bf16
    k = qkv_sc[:, cqp:2 * cqp]                                          # [HW, cqp] bf16
    v = qkv_sc[:, 2 * cqp:]                                             # [HW, C]   bf16 (gamma-scaled)

    # energy[i, j] = <q_i, k_j>; zero-padded query/key lanes contribute exactly 0.
    energy = lax.dot_general(q, k, (((1,), (1,)), ((), ())),
                             preferred_element_type=jnp.float32)        # [tq, HW] f32

    # Row softmax (f32 statistics), normalized with an EUP reciprocal.
    m = jnp.max(energy, axis=-1, keepdims=True)
    p = jnp.exp(energy - m)
    inv = pl.reciprocal(jnp.sum(p, axis=-1, keepdims=True), approx=True)
    attn = (p * inv).astype(jnp.bfloat16)

    # out_i = sum_j attn[i, j] * (gamma * v_j)  == gamma * bmm(V, A^T) rows.
    out = jnp.dot(attn, v, preferred_element_type=jnp.float32)          # [tq, C] f32

    # Residual: re-read only the tq rows of x (f32, exact), then store.
    x_rows = x_ref[pl.ds(row0, tq), :]
    o_ref[...] = (out + x_rows).astype(o_ref.dtype)


# ----------------------------------------------------------------------------
# Wrapper: boundary layout change + one fused pallas_call over (batch, row tiles).
# ----------------------------------------------------------------------------
def global_attention_pallas(x_nchw, W, *, tq=128):
    B, C, H, Wd = x_nchw.shape
    HW = H * Wd
    tq = min(tq, HW)
    assert HW % tq == 0, (HW, tq)
    n3 = W["wqkv"].shape[1]

    # Boundary layout change NCHW -> [B, HW, C].  If the surrounding model is
    # channels-last these two transposes disappear entirely.
    x_cl = jnp.transpose(x_nchw, (0, 2, 3, 1)).reshape(B, HW, C)

    out_cl = pl.pallas_call(
        _gab_kernel,
        out_shape=jax.ShapeDtypeStruct((B, HW, C), x_cl.dtype),
        grid=(B, HW // tq),
        in_specs=[
            pl.BlockSpec((None, HW, C), lambda b, r: (b, 0, 0)),   # x (all rows of batch b)
            pl.BlockSpec((C, n3), lambda b, r: (0, 0)),            # fused Wqkv (bf16)
            pl.BlockSpec((1, n3), lambda b, r: (0, 0)),            # fused bias (f32)
        ],
        out_specs=pl.BlockSpec((None, tq, C), lambda b, r: (b, r, 0)),
        scratch_shapes=[pltpu.VMEM((HW, n3), jnp.bfloat16)],       # per-batch Q/K/V cache
        compiler_params=pltpu.CompilerParams(
            dimension_semantics=("parallel", "arbitrary")),
    )(x_cl, W["wqkv"], W["bqkv"])

    return jnp.transpose(out_cl.reshape(B, H, Wd, C), (0, 3, 1, 2))


# ----------------------------------------------------------------------------
# One-time parameter preparation (hoisted out of the forward pass).
# PyTorch Conv2d weight [Cout, Cin, 1, 1] -> channels-last matmul weight
# [Cin, Cout]; query/key output dims zero-padded to 128 lanes; gamma folded
# into the V columns; everything concatenated into one fused bf16 weight.
# ----------------------------------------------------------------------------
def prepare_params(P, lane=128):
    C = P["wv"].shape[0]
    cq = P["wq"].shape[0]
    cqp = ((cq + lane - 1) // lane) * lane
    gamma = P["gamma"].reshape(()).astype(jnp.float32)

    def w_cl(w):                                   # [Cout, Cin, 1, 1] -> [Cin, Cout]
        return jnp.transpose(w[:, :, 0, 0], (1, 0))

    def pad_cols(a, n):
        return jnp.pad(a, ((0, 0), (0, n - a.shape[1])))

    wq = pad_cols(w_cl(P["wq"]), cqp)
    wk = pad_cols(w_cl(P["wk"]), cqp)
    wv = gamma * w_cl(P["wv"])
    bq = pad_cols(P["bq"].reshape(1, cq), cqp)
    bk = pad_cols(P["bk"].reshape(1, cq), cqp)
    bv = (gamma * P["bv"]).reshape(1, C)

    return dict(
        wqkv=jnp.concatenate([wq, wk, wv], axis=1).astype(jnp.bfloat16),  # [C, 2*128+C]
        bqkv=jnp.concatenate([bq, bk, bv], axis=1).astype(jnp.float32),   # [1, 2*128+C]
    )


# ----------------------------------------------------------------------------
# Pure-JAX reference with the exact PyTorch (NCHW) semantics.
# ----------------------------------------------------------------------------
def global_attention_ref(x, P):
    B, C, H, Wd = x.shape

    def conv1x1(x, w, b):
        return jnp.einsum("bchw,oc->bohw", x, w[:, :, 0, 0]) + b[None, :, None, None]

    q = conv1x1(x, P["wq"], P["bq"]).reshape(B, -1, H * Wd).transpose(0, 2, 1)
    k = conv1x1(x, P["wk"], P["bk"]).reshape(B, -1, H * Wd)
    energy = jnp.einsum("bic,bcj->bij", q, k)
    attn = jax.nn.softmax(energy, axis=-1)
    v = conv1x1(x, P["wv"], P["bv"]).reshape(B, -1, H * Wd)
    out = jnp.einsum("bcj,bij->bci", v, attn).reshape(B, C, H, Wd)
    return P["gamma"] * out + x


# ----------------------------------------------------------------------------
# Deterministic synthetic parameters (shapes as in GlobalAttentionBlock.__init__).
# ----------------------------------------------------------------------------
def make_params(key, in_dim):
    cq = in_dim // 32
    ks = jax.random.split(key, 6)
    std = 1.0 / math.sqrt(in_dim)

    def conv_w(k, cout):
        return jax.random.uniform(k, (cout, in_dim, 1, 1), jnp.float32, -std, std)

    def conv_b(k, cout):
        return jax.random.uniform(k, (cout,), jnp.float32, -std, std)

    return dict(
        wq=conv_w(ks[0], cq),     bq=conv_b(ks[1], cq),
        wk=conv_w(ks[2], cq),     bk=conv_b(ks[3], cq),
        wv=conv_w(ks[4], in_dim), bv=conv_b(ks[5], in_dim),
        # The module initializes gamma to 0 (output == input); use a nonzero
        # value so the numerical check actually exercises the attention path.
        gamma=jnp.full((1,), 0.5, jnp.float32),
    )


# ----------------------------------------------------------------------------
if __name__ == "__main__":
    B, C, H, W = 2, 128, 16, 16          # in_dim = 128 -> query/key dim = 4

    key = jax.random.PRNGKey(0)
    kx, kp = jax.random.split(key)

    x_nchw = jax.random.normal(kx, (B, C, H, W), jnp.float32)
    P = make_params(kp, C)
    Wprep = prepare_params(P)            # one-time prep, outside the forward

    out_pallas = jax.block_until_ready(global_attention_pallas(x_nchw, Wprep))
    out_ref = jax.block_until_ready(global_attention_ref(x_nchw, P))

    assert out_pallas.shape == (B, C, H, W), out_pallas.shape
    max_err = float(jnp.max(jnp.abs(out_pallas - out_ref)))
    # bf16 MXU operands + approx EUP reciprocal -> loosened vs. the f32 1e-3 check.
    assert max_err < 5e-2, f"max abs err {max_err}"

    print("KERNEL_OK")
</pallas_src>

<mosaic_0001>
module attributes {stable_mosaic.version = 11 : i64} {
  func.func @_gab_kernel(%arg0: i32, %arg1: i32, %arg2: memref<1x256x128xf32, #tpu.memory_space<vmem>>, %arg3: memref<128x384xbf16, #tpu.memory_space<vmem>>, %arg4: memref<1x384xf32, #tpu.memory_space<vmem>>, %arg5: memref<1x128x128xf32, #tpu.memory_space<vmem>>, %arg6: memref<256x384xbf16, #tpu.memory_space<vmem>>) attributes {dimension_semantics = [#tpu.dimension_semantics<parallel>, #tpu.dimension_semantics<arbitrary>], iteration_bounds = array<i64: 2, 2>, scalar_prefetch = 0 : i64, scratch_operands = 1 : i64, tpu.core_type = #tpu.core_type<tc>, window_params = [{transform_indices = @transform_0, window_bounds = array<i64: 1, 256, 128>}, {pipeline_mode = #tpu.pipeline_mode<synchronous>, transform_indices = @transform_1, window_bounds = array<i64: 128, 384>}, {pipeline_mode = #tpu.pipeline_mode<synchronous>, transform_indices = @transform_2, window_bounds = array<i64: 1, 384>}, {transform_indices = @transform_3, window_bounds = array<i64: 1, 128, 128>}]} {
    %c0_i32 = arith.constant 0 : i32
    %0 = arith.cmpi eq, %arg1, %c0_i32 : i32
    %1 = arith.extui %0 : i1 to i32
    %c0_i32_0 = arith.constant 0 : i32
    %2 = arith.cmpi ne, %1, %c0_i32_0 : i32
    scf.if %2 {
      %c0_11 = arith.constant 0 : index
      %c0_12 = arith.constant 0 : index
      %c0_13 = arith.constant 0 : index
      %30 = vector.load %arg2[%c0_11, %c0_12, %c0_13] : memref<1x256x128xf32, #tpu.memory_space<vmem>>, vector<1x256x128xf32>
      %31 = vector.shape_cast %30 : vector<1x256x128xf32> to vector<256x128xf32>
      %32 = arith.truncf %31 : vector<256x128xf32> to vector<256x128xbf16>
      %c0_14 = arith.constant 0 : index
      %c0_15 = arith.constant 0 : index
      %33 = vector.load %arg3[%c0_14, %c0_15] : memref<128x384xbf16, #tpu.memory_space<vmem>>, vector<128x384xbf16>
      %cst_16 = arith.constant dense<0.000000e+00> : vector<256x384xf32>
      %34 = tpu.matmul %32, %33, %cst_16 {dimension_numbers = #tpu.dot_dimension_numbers<[1], [0], [0], [1], [0, 0, 1, 1], [], []>} : vector<256x128xbf16>, vector<128x384xbf16>, vector<256x384xf32> -> vector<256x384xf32>
      %c0_17 = arith.constant 0 : index
      %c0_18 = arith.constant 0 : index
      %35 = vector.load %arg4[%c0_17, %c0_18] : memref<1x384xf32, #tpu.memory_space<vmem>>, vector<1x384xf32>
      %36 = vector.broadcast %35 : vector<1x384xf32> to vector<256x384xf32>
      %37 = arith.addf %34, %36 : vector<256x384xf32>
      %38 = arith.truncf %37 : vector<256x384xf32> to vector<256x384xbf16>
      %c0_19 = arith.constant 0 : index
      %c0_20 = arith.constant 0 : index
      %39 = vector.load %arg6[%c0_19, %c0_20] : memref<256x384xbf16, #tpu.memory_space<vmem>>, vector<256x384xbf16>
      tpu.vector_store %arg6[%c0_19, %c0_20], %38 {strides = array<i32>} : memref<256x384xbf16, #tpu.memory_space<vmem>>, vector<256x384xbf16>,
    } else {
    }
    %c128_i32 = arith.constant 128 : i32
    %3 = arith.muli %arg1, %c128_i32 : i32
    %4 = tpu.assume_multiple %3, 128 : i32
    %5 = arith.index_cast %4 : i32 to index
    %c0 = arith.constant 0 : index
    %6 = vector.load %arg6[%5, %c0] : memref<256x384xbf16, #tpu.memory_space<vmem>>, vector<128x384xbf16>
    %7 = vector.extract_strided_slice %6 {offsets = [0, 0], sizes = [128, 128], strides = [1, 1]} : vector<128x384xbf16> to vector<128x128xbf16>
    %c0_1 = arith.constant 0 : index
    %c128 = arith.constant 128 : index
    %8 = vector.load %arg6[%c0_1, %c128] : memref<256x384xbf16, #tpu.memory_space<vmem>>, vector<256x128xbf16>
    %c0_2 = arith.constant 0 : index
    %c256 = arith.constant 256 : index
    %9 = vector.load %arg6[%c0_2, %c256] : memref<256x384xbf16, #tpu.memory_space<vmem>>, vector<256x128xbf16>
    %cst = arith.constant dense<0.000000e+00> : vector<128x256xf32>
    %10 = tpu.matmul %7, %8, %cst {dimension_numbers = #tpu.dot_dimension_numbers<[1], [1], [0], [0], [0, 0, 1, 0], [], []>} : vector<128x128xbf16>, vector<256x128xbf16>, vector<128x256xf32> -> vector<128x256xf32>
    %cst_3 = arith.constant dense<0xFF800000> : vector<128xf32>
    %11 = vector.multi_reduction <maximumf>, %10, %cst_3 [1] : vector<128x256xf32> to vector<128xf32>
    %12 = vector.shape_cast %11 : vector<128xf32> to vector<128x1xf32>
    %13 = vector.broadcast %12 : vector<128x1xf32> to vector<128x256xf32>
    %14 = arith.subf %10, %13 : vector<128x256xf32>
    %15 = math.exp %14 : vector<128x256xf32>
    %cst_4 = arith.constant dense<0.000000e+00> : vector<128xf32>
    %16 = vector.multi_reduction <add>, %15, %cst_4 [1] : vector<128x256xf32> to vector<128xf32>
    %17 = vector.shape_cast %16 : vector<128xf32> to vector<128x1xf32>
    %18 = tpu.reciprocal %17 {approx = true} : vector<128x1xf32> -> vector<128x1xf32>
    %19 = vector.broadcast %18 : vector<128x1xf32> to vector<128x256xf32>
    %20 = arith.mulf %15, %19 : vector<128x256xf32>
    %21 = arith.truncf %20 : vector<128x256xf32> to vector<128x256xbf16>
    %cst_5 = arith.constant dense<0.000000e+00> : vector<128x128xf32>
    %22 = tpu.matmul %21, %9, %cst_5 {dimension_numbers = #tpu.dot_dimension_numbers<[1], [0], [0], [1], [0, 0, 1, 1], [], []>} : vector<128x256xbf16>, vector<256x128xbf16>, vector<128x128xf32> -> vector<128x128xf32>
    %c0_6 = arith.constant 0 : index
    %23 = arith.index_cast %4 : i32 to index
    %c0_7 = arith.constant 0 : index
    %24 = vector.load %arg2[%c0_6, %23, %c0_7] : memref<1x256x128xf32, #tpu.memory_space<vmem>>, vector<1x128x128xf32>
    %25 = vector.shape_cast %24 : vector<1x128x128xf32> to vector<128x128xf32>
    %26 = arith.addf %22, %25 : vector<128x128xf32>
    %c0_8 = arith.constant 0 : index
    %c0_9 = arith.constant 0 : index
    %c0_10 = arith.constant 0 : index
    %27 = vector.load %arg5[%c0_8, %c0_9, %c0_10] : memref<1x128x128xf32, #tpu.memory_space<vmem>>, vector<1x128x128xf32>
    %28 = vector.shape_cast %27 : vector<1x128x128xf32> to vector<128x128xf32>
    %29 = vector.shape_cast %26 : vector<128x128xf32> to vector<1x128x128xf32>
    tpu.vector_store %arg5[%c0_8, %c0_9, %c0_10], %29 {strides = array<i32>} : memref<1x128x128xf32, #tpu.memory_space<vmem>>, vector<1x128x128xf32>,
    return
  }
  func.func @transform_0(%arg0: i32, %arg1: i32) -> (i32, i32, i32) {
    %c0_i32 = arith.constant 0 : i32
    %c0_i32_0 = arith.constant 0 : i32
    %c0_i32_1 = arith.constant 0 : i32
    return %arg0, %c0_i32, %c0_i32_0 : i32, i32, i32
  }
  func.func @transform_1(%arg0: i32, %arg1: i32) -> (i32, i32) {
    %c0_i32 = arith.constant 0 : i32
    %c0_i32_0 = arith.constant 0 : i32
    %c0_i32_1 = arith.constant 0 : i32
    return %c0_i32, %c0_i32_0 : i32, i32
  }
  func.func @transform_2(%arg0: i32, %arg1: i32) -> (i32, i32) {
    %c0_i32 = arith.constant 0 : i32
    %c0_i32_0 = arith.constant 0 : i32
    %c0_i32_1 = arith.constant 0 : i32
    return %c0_i32, %c0_i32_0 : i32, i32
  }
  func.func @transform_3(%arg0: i32, %arg1: i32) -> (i32, i32, i32) {
    %c0_i32 = arith.constant 0 : i32
    %c0_i32_0 = arith.constant 0 : i32
    return %arg0, %arg1, %c0_i32 : i32, i32, i32
  }
}

</mosaic_0001>

<bundles_post_ra>
// kernel: tpu_custom_call.1
= control target key start
LH: loop header
LB: loop body
LE: loop exit
PB: predicated region body
PF: predicated region fallthrough
CT: control target
= control target key end

     0   :  { %s3351_s0 = inlined_call_operand.hbm [shape: f32[2,256,128], index: 0, kind: input, shape index: {}]   ;;  %s3352_s1 = inlined_call_operand.hbm [shape: bf16[128,384], index: 1, kind: input, shape index: {}]   ;;  %s3353_s2 = inlined_call_operand.hbm [shape: f32[1,384], index: 2, kind: input, shape index: {}]   ;;  %s3354_s3 = inlined_call_operand.hbm [shape: f32[2,256,128], index: 3, kind: output, shape index: {}]  }
   0x1   :  { %3362 = sst [smem:[#allocation19_spill]] %s3352_s1 }
   0x2   :  { %3363 = sst [smem:[#allocation20_spill]] %s3353_s2 }
   0x3   :  { %8 = vsyncpa [#allocation4], 0 }
   0x4   :  { %10 = vsyncpa [#allocation4 + $0x1], 0 }
   0x5   :  { %11 = vsyncpa [#allocation7], 0 }
   0x6   :  { %12 = vsyncpa [#allocation5], 0 }
   0x7   :  { %14 = vsyncpa [#allocation5 + $0x1], 0  ;;  %s2631_s12 = smov 0   ;;  %s2633_s13 = smov 0  }
   0x8   :  { %s2635_s14 = smov 0   ;;  %s2637_s15 = smov 0  }
   0x9   :  { %s2639_s16 = smov 0   ;;  %s2641_s17 = smov 0  }
   0xa   :  { %s2643_s18 = smov 0   ;;  %s2645_s19 = smov 0  }
   0xb   :  { %s2647_s20 = smov 0   ;;  %s2649_s21 = smov 0  }
   0xc   :  { %s2651_s22 = smov 0  }
   0xd LB: > { %3364 = sst [smem:[#allocation13_spill]] %s2561_s12  ;;  %s1791_s23 = sadd.s32 4294967295, %s2601_s22   ;;  %s2601_s22 = sphi %s2651_s22, %s20_s22   ;;  %s2597_s21 = sphi %s2649_s21, %s3391_s21   ;;  %s2593_s20 = sphi %s2647_s20, %s3382_s20   ;;  %s2589_s19 = sphi %s2645_s19, %s3390_s19   ;;  %s2585_s18 = sphi %s2643_s18, %s3381_s18   ;;  %s2581_s17 = sphi %s2641_s17, %s3389_s17   ;;  %s2577_s16 = sphi %s2639_s16, %s3388_s16   ;;  %s2573_s15 = sphi %s2637_s15, %s3387_s15   ;;  %s2569_s14 = sphi %s2635_s14, %s3386_s14   ;;  %s2565_s13 = sphi %s2633_s13, %s3385_s13   ;;  %s2561_s12 = sphi %s2631_s12, %s3384_s12  }
   0xe   : > { %3365 = sst [smem:[#allocation14_spill]] %s2593_s20  ;;  %s1792_s24 = sadd.s32 4294967294, %s2601_s22  }
   0xf   : > { %p52_p0 = scmp.ne.s32.totalorder %s2577_s16, %s2573_s15  ;;  %p2687_p1 = scmp.eq.s32.totalorder %s1791_s23, 0 }
  0x10   : > { %p119_p2 = scmp.ne.s32.totalorder %s2569_s14, %s2565_s13  ;;  %p120_p3 = scmp.eq.s32.totalorder %s1791_s23, 3 }
  0x11   : > { %p2695_p4 = por %p2687_p1, %p52_p0  ;;  %p125_p5 = scmp.ne.s32.totalorder %s2565_s13, %s2561_s12 }
  0x12   : > { %p2701_p6 = por %p120_p3, %p119_p2  ;;  %p126_p7 = scmp.eq.s32.totalorder %s1792_s24, 3 }
  0x13   : > { %p1793_p8 = scmp.ge.s32.totalorder %s2601_s22, 1  ;;  %p133_p9 = scmp.lt.s32.totalorder %s2601_s22, 5 }
  0x14   : > { %s3368_s27 = scalar_select %p2701_p6, 1, 0 }
  0x15   : > { %p2707_p10 = por %p126_p7, %p125_p5  ;;  %p2711_p11 = pnand %p1793_p8, %p133_p9 }
  0x16   : > { %3369 = sst [smem:[#allocation15_spill]] %s3368_s27  ;;  %s2603_s6 = smov [#allocation6]  }
  0x17   : > { %s3370_s28 = scalar_select %p2707_p10, 1, 0 }
  0x18   : > { %s3373_s1 = sld [smem:[#allocation19_spill]]  ;;  %p2172_p12 = pneg %p2711_p11 }
  0x19   : > { %3371 = sst [smem:[#allocation16_spill]] %s3370_s28  ;;  %s146_s7 = sshll.u32 %s2603_s6, 4  ;;  %s147_s7 = int_to_ptr.vmem [resolvable:$true] %s146_s7 }
  0x1a   : > { %p2173_p13 = pnand %p2172_p12, %p2687_p1  ;;  %s3374_s2 = sld [smem:[#allocation20_spill]] }
  0x1b   : > { %s2604_s11 = smov 192   ;;  %s2605_s15 = smov 12  }
  0x1c   : > { %s2606_s23 = smov [#allocation8]   ;;  %s29_s30 = sadd.s32 1, %s2593_s20 }
  0x1d   : > { %s161_s24 = sshll.u32 %s2606_s23, 4  ;;  %p30_p0 = scmp.ge.s32.totalorder %s29_s30, 2  ;;  %s162_s24 = int_to_ptr.vmem [resolvable:$true] %s161_s24 }
  0x1e   : > { %s144_s5 = sshll.u32 %s3373_s1, 4  ;;  %s32_s4 = sadd.s32 1, %s2597_s21  ;;  %s145_s5 = int_to_ptr.hbm [resolvable:$true] %s144_s5 }
  0x1f   : > { %2175 = dma.hbm_to_vmem [thread:$0]  (!%p2173_p13), %s145_s5, 3072, %s147_s7, [#allocation7], %s2604_s11, %s2604_s11, %s2605_s15  }
  0x20   : > { %s159_s10 = sshll.u32 %s3374_s2, 4  ;;  %s39_s6 = sadd.s32 1, %s2581_s17  ;;  %s160_s10 = int_to_ptr.hbm [resolvable:$true] %s159_s10 }
  0x21   : > { %2178 = dma.hbm_to_vmem [thread:$0]  (!%p2173_p13), %s160_s10, 48, %s162_s24, [#allocation7]  }
  0x22   : > { %p46_p2 = scmp.ne.s32.totalorder %s2581_s17, %s2577_s16  ;;  %s3393_s30 = smov (%p30_p0, %s29_s30), 0 }
  0x23   : > { %3375 = sst [smem:[#allocation17_spill]] %s3393_s30  ;;  %s3395_s4 = smov (!%p30_p0, %s32_s4), %s2597_s21 }
  0x24   : > { %p47_p3 = scmp.eq.s32.totalorder %s2601_s22, 0  ;;  %s105_s5 = ssub.s32 %s2593_s20, %s3393_s30 }
  0x25   : > { %p34_p5 = scmp.ge.s32.totalorder %s3395_s4, 2  ;;  %s109_s7 = sadd.s32 1, %s2569_s14 }
  0x26   : > { %p2737_p7 = por %p47_p3, %p46_p2  ;;  %p2189_p8 = scmp.lt.s32.totalorder %s2601_s22, 4 }
  0x27   : > { %s3397_s4 = smov (%p34_p5, %s3395_s4), 0  ;;  %s172_s9 = sand.u32 1, %s2581_s17  }
  0x28   : > { %3377 = sst [smem:[#allocation18_spill]] %s3397_s4  ;;  %s2070_s10 = sshll.u32 %s2597_s21, 8 }
  0x29   : > { %s36_s11 = ssub.s32 %s2597_s21, %s3397_s4  ;;  %s1797_s23 = sshll.u32 %s172_s9, 8 }
  0x2a   : > { %p37_p9 = scmp.eq.s32.totalorder %s36_s11, 0  ;;  %s106_s15 = sor.u32 %s105_s5, %s36_s11 }
  0x2b   : > { %p107_p12 = scmp.eq.s32.totalorder %s106_s15, 0  ;;  %s181_s20 = scalar_lea.hbm %s3351_s0, %s2070_s10 }
  0x2c   : > { %s2749_s24 = scalar_select %p37_p9, %s2581_s17, %s39_s6  }
  0x2d   : > { %s2752_s1 = scalar_select %p107_p12, %s2569_s14, %s109_s7  }
  0x2e   : > { %s182_s28 = sshll.u32 %s181_s20, 4  ;;  %s176_s12 = scalar_lea.vmem [#allocation3], %s1797_s23  ;;  %s183_s28 = int_to_ptr.hbm [resolvable:$true] %s182_s28 }
  0x2f   : > { %s184_s27 = sshll.u32 %s176_s12, 4  ;;  %p2180_p13 = pnand %p2189_p8, %p2737_p7  ;;  %s185_s27 = int_to_ptr.vmem [resolvable:$true] %s184_s27 }
  0x30   : > { %s173_s4 = scalar_lea.sflag [#allocation4], %s172_s9  ;;  %s2607_s5 = smov 128  }
  0x31   : > { %s2608_s11 = smov 8   ;;  %196 = sbr.rel (%p2711_p11) target bundleno = 1207 (0x4b7), region = 32 }
  0x32   : > { %2182 = dma.hbm_to_vmem [thread:$0]  (!%p2180_p13), %s183_s28, 4096, %s185_s27, %s173_s4, %s2607_s5, %s2607_s5, %s2608_s11  }
  0x33   : > { %s198_s6 = sand.u32 (!%p2711_p11), 1, %s2577_s16  }
  0x34   : > { %s1801_s2 = sshll.u32 (!%p2711_p11), %s198_s6, 8  ;;  %s199_s30 = scalar_lea.sflag (!%p2711_p11), [#allocation4], %s198_s6 }
  0x35   : > { %s2764_s20 = scalar_lea.vmem (!%p2711_p11), [#allocation3], %s1801_s2 }
  0x36   : > { %2548 = dma.done.wait (%p2695_p4), %s199_s30, 4096  }
  0x37   : > { %2550 = vsyncadd (%p2695_p4), %s199_s30, 4294963200 }
  0x38   : > { %2552 = dma.done.wait (%p2687_p1), [#allocation7], 3120  }
  0x39   : > { %2554 = vsyncadd (%p2687_p1), [#allocation7], 4294964176  ;;  %s233_s12 = sand.u32 1, %s2565_s13   ;;  %p1805_p11 = scmp.ne.s32.totalorder %s2585_s18, 0 }
  0x3a   : > { %s1804_s27 = sshll.u32 %s233_s12, 7 }
  0x3b   : > { %s2777_s28 = scalar_lea.vmem [#allocation9], %s1804_s27  ;;  %240 = sbr.rel (%p1805_p11) target bundleno = 421 (0x1a5), region = 48 }
  0x40   : > { %v1892_v0 = vld [vmem:[#allocation6 + $0xa8] sm:$0xf]  ;;  %v2093_v1 = vld [vmem:[#allocation6 + $0xb0] sm:$0xf0]  ;;  %v2092_v2 = vld [vmem:[#allocation6 + $0xac] sm:$0xf] }
  0x41   : > { %v1893_v3 = vor.u32 %v2093_v1, %v1892_v0  ;;  %v1894_v4 = vld [vmem:[#allocation6 + $0xb4] sm:$0xf0]  ;;  %v1900_v5 = vld [vmem:[#allocation6 + $0xb0] sm:$0xf]  ;;  %v2094_v6 = vld [vmem:[#allocation6 + $0xb8] sm:$0xf0] }
  0x42   : > { %v2780_v7 = vor.u32 %v2092_v2, %v1894_v4  ;;  %v2782_v8 = vor.u32 %v2094_v6, %v1900_v5  ;;  %v1880_v9 = vld [vmem:[#allocation6 + $0x90] sm:$0xf]  ;;  %v2090_v10 = vld [vmem:[#allocation6 + $0x98] sm:$0xf0]  ;;  %v2089_v11 = vld [vmem:[#allocation6 + $0x94] sm:$0xf] }
  0x43   : > { %457 = vmatpush.bf16.msra.mxu0 %v1893_v3  ;;  %2136 = vmatpush.bf16.msra.mxu3 %v1893_v3  ;;  %v1881_v12 = vor.u32 %v2090_v10, %v1880_v9  ;;  %v1882_v13 = vld [vmem:[#allocation6 + $0x9c] sm:$0xf0]  ;;  %v1888_v14 = vld [vmem:[#allocation6 + $0x98] sm:$0xf]  ;;  %v2091_v15 = vld [vmem:[#allocation6 + $0xa0] sm:$0xf0] }
  0x44   : > { %546 = vmatpush.bf16.msra.mxu1 %v2780_v7  ;;  %635 = vmatpush.bf16.msra.mxu2 %v2782_v8  ;;  %v2786_v16 = vor.u32 %v2089_v11, %v1882_v13  ;;  %v2788_v17 = vor.u32 %v2091_v15, %v1888_v14  ;;  %v1868_v18 = vld [vmem:[#allocation6 + $0x78] sm:$0xf]  ;;  %v2087_v19 = vld [vmem:[#allocation6 + $0x80] sm:$0xf0]  ;;  %v2086_v20 = vld [vmem:[#allocation6 + $0x7c] sm:$0xf] }
  0x45   : > { %v1870_v21 = vld [vmem:[#allocation6 + $0x84] sm:$0xf0]  ;;  %v1876_v22 = vld [vmem:[#allocation6 + $0x80] sm:$0xf]  ;;  %v2088_v23 = vld [vmem:[#allocation6 + $0x88] sm:$0xf0]  ;;  %v1869_v24 = vor.u32 %v2087_v19, %v1868_v18 }
  0x46   : > { %v2792_v25 = vor.u32 %v2086_v20, %v1870_v21  ;;  %v2794_v26 = vor.u32 %v2088_v23, %v1876_v22  ;;  %v1856_v27 = vld [vmem:[#allocation6 + $0x60] sm:$0xf]  ;;  %v2084_v28 = vld [vmem:[#allocation6 + $0x68] sm:$0xf0]  ;;  %v2083_v29 = vld [vmem:[#allocation6 + $0x64] sm:$0xf] }
  0x47   : > { %458 = vmatpush.bf16.msra.mxu0 %v1881_v12  ;;  %2137 = vmatpush.bf16.msra.mxu3 %v1881_v12  ;;  %v1858_v30 = vld [vmem:[#allocation6 + $0x6c] sm:$0xf0]  ;;  %v1864_v31 = vld [vmem:[#allocation6 + $0x68] sm:$0xf]  ;;  %v2085_v32 = vld [vmem:[#allocation6 + $0x70] sm:$0xf0]  ;;  %v1857_v33 = vor.u32 %v2084_v28, %v1856_v27 }
  0x48   : > { %547 = vmatpush.bf16.msra.mxu1 %v2786_v16  ;;  %636 = vmatpush.bf16.msra.mxu2 %v2788_v17  ;;  %v2798_v34 = vor.u32 %v2083_v29, %v1858_v30  ;;  %v2800_v35 = vor.u32 %v2085_v32, %v1864_v31  ;;  %v1844_v36 = vld [vmem:[#allocation6 + $0x48] sm:$0xf]  ;;  %v2081_v37 = vld [vmem:[#allocation6 + $0x50] sm:$0xf0]  ;;  %v2080_v38 = vld [vmem:[#allocation6 + $0x4c] sm:$0xf] }
  0x49   : > { %v1846_v39 = vld [vmem:[#allocation6 + $0x54] sm:$0xf0]  ;;  %v1852_v40 = vld [vmem:[#allocation6 + $0x50] sm:$0xf]  ;;  %v2082_v41 = vld [vmem:[#allocation6 + $0x58] sm:$0xf0]  ;;  %v1845_v42 = vor.u32 %v2081_v37, %v1844_v36 }
  0x4a   : > { %v2804_v43 = vor.u32 %v2080_v38, %v1846_v39  ;;  %v2806_v44 = vor.u32 %v2082_v41, %v1852_v40  ;;  %v1832_v45 = vld [vmem:[#allocation6 + $0x30] sm:$0xf]  ;;  %v2078_v46 = vld [vmem:[#allocation6 + $0x38] sm:$0xf0]  ;;  %v2077_v47 = vld [vmem:[#allocation6 + $0x34] sm:$0xf] }
  0x4b   : > { %459 = vmatpush.bf16.msra.mxu0 %v1869_v24  ;;  %2138 = vmatpush.bf16.msra.mxu3 %v1869_v24  ;;  %v1834_v48 = vld [vmem:[#allocation6 + $0x3c] sm:$0xf0]  ;;  %v1840_v49 = vld [vmem:[#allocation6 + $0x38] sm:$0xf]  ;;  %v2079_v50 = vld [vmem:[#allocation6 + $0x40] sm:$0xf0]  ;;  %v1833_v51 = vor.u32 %v2078_v46, %v1832_v45 }
  0x4c   : > { %548 = vmatpush.bf16.msra.mxu1 %v2792_v25  ;;  %637 = vmatpush.bf16.msra.mxu2 %v2794_v26  ;;  %v1837_v52 = vor.u32 %v2077_v47, %v1834_v48  ;;  %v2810_v53 = vor.u32 %v2079_v50, %v1840_v49  ;;  %v1820_v54 = vld [vmem:[#allocation6 + $0x18] sm:$0xf]  ;;  %v2075_v55 = vld [vmem:[#allocation6 + $0x20] sm:$0xf0]  ;;  %v2074_v56 = vld [vmem:[#allocation6 + $0x1c] sm:$0xf] }
  0x4d   : > { %v1822_v57 = vld [vmem:[#allocation6 + $0x24] sm:$0xf0]  ;;  %v1828_v58 = vld [vmem:[#allocation6 + $0x20] sm:$0xf]  ;;  %v2076_v59 = vld [vmem:[#allocation6 + $0x28] sm:$0xf0]  ;;  %v1821_v60 = vor.u32 %v2075_v55, %v1820_v54 }
  0x4e   : > { %v1825_v61 = vor.u32 %v2074_v56, %v1822_v57  ;;  %v2813_v62 = vor.u32 %v2076_v59, %v1828_v58  ;;  %v1808_v63 = vld [vmem:[#allocation6] sm:$0xf]  ;;  %v2072_v0 = vld [vmem:[#allocation6 + $0x8] sm:$0xf0]  ;;  %v2071_v1 = vld [vmem:[#allocation6 + $0x4] sm:$0xf] }
  0x4f   : > { %460 = vmatpush.bf16.msra.mxu0 %v1857_v33  ;;  %2139 = vmatpush.bf16.msra.mxu3 %v1857_v33  ;;  %v1810_v2 = vld [vmem:[#allocation6 + $0xc] sm:$0xf0]  ;;  %v1816_v3 = vld [vmem:[#allocation6 + $0x8] sm:$0xf]  ;;  %v2073_v4 = vld [vmem:[#allocation6 + $0x10] sm:$0xf0]  ;;  %v1809_v6 = vor.u32 %v2072_v0, %v1808_v63 }
  0x50   : > { %549 = vmatpush.bf16.msra.mxu1 %v2798_v34  ;;  %638 = vmatpush.bf16.msra.mxu2 %v2800_v35  ;;  %v241_v5 = vld [vmem:[%s2764_s20] sm:$0xff]  ;;  %v242_v9 = vld [vmem:[%s2764_s20 + $0x8] sm:$0xff]  ;;  %v1813_v12 = vor.u32 %v2071_v1, %v1810_v2  ;;  %v1817_v13 = vor.u32 %v2073_v4, %v1816_v3  ;;  %v243_v18 = vld [vmem:[%s2764_s20 + $0x10] sm:$0xff] }
  0x51   : > { %v265_v10 = vld [vmem:[%s2764_s20 + $0xc0] sm:$0xff]  ;;  %v266_v11 = vld [vmem:[%s2764_s20 + $0xc8] sm:$0xff]  ;;  %v273_v14 = vpack.c.bf16 %v242_v9, %v241_v5  ;;  %v244_v19 = vld [vmem:[%s2764_s20 + $0x18] sm:$0xff] }
  0x52   : > { %v2820_v15 = vpack.c.bf16 %v266_v11, %v265_v10  ;;  %v267_v20 = vld [vmem:[%s2764_s20 + $0xd0] sm:$0xff]  ;;  %v268_v21 = vld [vmem:[%s2764_s20 + $0xd8] sm:$0xff]  ;;  %v246_v23 = vld [vmem:[%s2764_s20 + $0x28] sm:$0xff] }
  0x53   : > { %461 = vmatpush.bf16.msra.mxu0 %v1845_v42  ;;  %2140 = vmatpush.bf16.msra.mxu3 %v1845_v42  ;;  %v2831_v22 = vpack.c.bf16 %v268_v21, %v267_v20  ;;  %v269_v24 = vld [vmem:[%s2764_s20 + $0xe0] sm:$0xff]  ;;  %v247_v29 = vld [vmem:[%s2764_s20 + $0x30] sm:$0xff]  ;;  %v248_v30 = vld [vmem:[%s2764_s20 + $0x38] sm:$0xff] }
  0x54   : > { %550 = vmatpush.bf16.msra.mxu1 %v2804_v43  ;;  %639 = vmatpush.bf16.msra.mxu2 %v2806_v44  ;;  %v271_v31 = vld [vmem:[%s2764_s20 + $0xf0] sm:$0xff]  ;;  %v272_v32 = vld [vmem:[%s2764_s20 + $0xf8] sm:$0xff]  ;;  %v276_v33 = vpack.c.bf16 %v248_v30, %v247_v29  ;;  %v253_v38 = vld [vmem:[%s2764_s20 + $0x60] sm:$0xff] }
  0x55   : > { %v252_v36 = vld [vmem:[%s2764_s20 + $0x58] sm:$0xff]  ;;  %v254_v39 = vld [vmem:[%s2764_s20 + $0x68] sm:$0xff]  ;;  %v255_v41 = vld [vmem:[%s2764_s20 + $0x70] sm:$0xff] }
  0x56   : > { %v279_v40 = vpack.c.bf16 %v254_v39, %v253_v38  ;;  %v256_v42 = vld [vmem:[%s2764_s20 + $0x78] sm:$0xff]  ;;  %v257_v45 = vld [vmem:[%s2764_s20 + $0x80] sm:$0xff]  ;;  %v258_v46 = vld [vmem:[%s2764_s20 + $0x88] sm:$0xff] }
  0x57   : > { %462 = vmatpush.bf16.msra.mxu0 %v1833_v51  ;;  %2141 = vmatpush.bf16.msra.mxu3 %v1833_v51  ;;  %v281_v49 = vpack.c.bf16 %v258_v46, %v257_v45  ;;  %v259_v1 = vld [vmem:[%s2764_s20 + $0x90] sm:$0xff]  ;;  %v260_v2 = vld [vmem:[%s2764_s20 + $0x98] sm:$0xff] }
  0x58   : > { %551 = vmatpush.bf16.msra.mxu1 %v1837_v52  ;;  %640 = vmatpush.bf16.msra.mxu2 %v2810_v53  ;;  %v282_v5 = vpack.c.bf16 %v260_v2, %v259_v1  ;;  %v264_v45 = vld [vmem:[%s2764_s20 + $0xb8] sm:$0xff] }
  0x5b   : > { %463 = vmatpush.bf16.msra.mxu0 %v1821_v60  ;;  %2142 = vmatpush.bf16.msra.mxu3 %v1821_v60 }
  0x5c   : > { %552 = vmatpush.bf16.msra.mxu1 %v1825_v61  ;;  %641 = vmatpush.bf16.msra.mxu2 %v2813_v62 }
  0x5f   : > { %464 = vmatpush.bf16.msra.mxu0 %v1809_v6  ;;  %2143 = vmatpush.bf16.msra.mxu3 %v1809_v6 }
  0x60   : > { %553 = vmatpush.bf16.msra.mxu1 %v1813_v12  ;;  %642 = vmatpush.bf16.msra.mxu2 %v1817_v13 }
  0x62   : > { %465 = vmatmul.bf16.vlgmr.msra.gmra.mxu0 %v273_v14  ;;  %525 = vmatmul.bf16.vlgmr.msra.gmra.mxu3 %v2820_v15 }
  0x63   : > { %2144 = vmatpush.bf16.msrb.mxu3 %v2780_v7  ;;  %554 = vmatmul.bf16.vlgmr.msra.gmra.mxu1 %v273_v14  ;;  %v274_v7 = vpack.c.bf16 %v244_v19, %v243_v18 }
  0x64   : > { %643 = vmatmul.bf16.vlgmr.msra.gmra.mxu2 %v273_v14 }
  0x67   : > { %2145 = vmatpush.bf16.msrb.mxu3 %v2786_v16  ;;  %v245_v16 = vld [vmem:[%s2764_s20 + $0x20] sm:$0xff] }
  0x68   : > { %v275_v27 = vpack.c.bf16 %v246_v23, %v245_v16 }
  0x6b   : > { %2146 = vmatpush.bf16.msrb.mxu3 %v2792_v25  ;;  %v270_v25 = vld [vmem:[%s2764_s20 + $0xe8] sm:$0xff] }
  0x6c   : > { %v2839_v28 = vpack.c.bf16 %v270_v25, %v269_v24  ;;  %v261_v24 = vld [vmem:[%s2764_s20 + $0xa0] sm:$0xff]  ;;  %v262_v25 = vld [vmem:[%s2764_s20 + $0xa8] sm:$0xff] }
  0x6d   : > { %v283_v30 = vpack.c.bf16 %v262_v25, %v261_v24 }
  0x6f   : > { %2147 = vmatpush.bf16.msrb.mxu3 %v2798_v34  ;;  %v2850_v34 = vpack.c.bf16 %v272_v32, %v271_v31 }
  0x72   : > { %470 = vmatmul.bf16.gmra.mxu0 %v274_v7  ;;  %530 = vmatmul.bf16.gmra.mxu3 %v2831_v22 }
  0x73   : > { %2148 = vmatpush.bf16.msrb.mxu3 %v2804_v43  ;;  %559 = vmatmul.bf16.gmra.mxu1 %v274_v7  ;;  %v280_v43 = vpack.c.bf16 %v256_v42, %v255_v41 }
  0x74   : > { %648 = vmatmul.bf16.gmra.mxu2 %v274_v7 }
  0x77   : > { %2149 = vmatpush.bf16.msrb.mxu3 %v1837_v52 }
  0x7b   : > { %2150 = vmatpush.bf16.msrb.mxu3 %v1825_v61 }
  0x7f   : > { %2151 = vmatpush.bf16.msrb.mxu3 %v1813_v12 }
  0x82   : > { %475 = vmatmul.bf16.gmra.mxu0 %v275_v27  ;;  %535 = vmatmul.bf16.gmra.mxu3 %v2839_v28 }
  0x83   : > { %2152 = vmatpush.bf16.msra.mxu3 %v2782_v8  ;;  %564 = vmatmul.bf16.gmra.mxu1 %v275_v27  ;;  %v249_v8 = vld [vmem:[%s2764_s20 + $0x40] sm:$0xff] }
  0x84   : > { %653 = vmatmul.bf16.gmra.mxu2 %v275_v27 }
  0x87   : > { %2153 = vmatpush.bf16.msra.mxu3 %v2788_v17  ;;  %v250_v17 = vld [vmem:[%s2764_s20 + $0x48] sm:$0xff] }
  0x8b   : > { %2154 = vmatpush.bf16.msra.mxu3 %v2794_v26  ;;  %v277_v26 = vpack.c.bf16 %v250_v17, %v249_v8 }
  0x8f   : > { %2155 = vmatpush.bf16.msra.mxu3 %v2800_v35  ;;  %v251_v35 = vld [vmem:[%s2764_s20 + $0x50] sm:$0xff] }
  0x90   : > { %v278_v37 = vpack.c.bf16 %v252_v36, %v251_v35 }
  0x92   : > { %480 = vmatmul.bf16.gmra.mxu0 %v276_v33  ;;  %540 = vmatmul.bf16.gmra.mxu3 %v2850_v34 }
  0x93   : > { %2156 = vmatpush.bf16.msra.mxu3 %v2806_v44  ;;  %569 = vmatmul.bf16.gmra.mxu1 %v276_v33  ;;  %v321_v44 = vld [vmem:[#allocation8] sm:$0x7] }
  0x94   : > { %658 = vmatmul.bf16.gmra.mxu2 %v276_v33  ;;  %v2870_v47 = vperm.slane %v321_v44, 0  ;;  %v2872_v48 = vperm.slane %v321_v44, 1  ;;  %v2877_v55 = vperm.slane %v321_v44, 2  ;;  %v263_v44 = vld [vmem:[%s2764_s20 + $0xb0] sm:$0xff] }
  0x97   : > { %2157 = vmatpush.bf16.msra.mxu3 %v2810_v53 }
  0x9b   : > { %2158 = vmatpush.bf16.msra.mxu3 %v2813_v62 }
  0x9f   : > { %2159 = vmatpush.bf16.msra.mxu3 %v1817_v13 }
  0xa2   : > { %485 = vmatmul.bf16.gmra.mxu0 %v277_v26  ;;  %614 = vmatmul.bf16.vlgmr.msrb.gmra.mxu3 %v2820_v15 }
  0xa3   : > { %574 = vmatmul.bf16.gmra.mxu1 %v277_v26 }
  0xa4   : > { %663 = vmatmul.bf16.gmra.mxu2 %v277_v26 }
  0xb2   : > { %490 = vmatmul.bf16.gmra.mxu0 %v278_v37  ;;  %619 = vmatmul.bf16.gmra.mxu3 %v2831_v22 }
  0xb3   : > { %579 = vmatmul.bf16.gmra.mxu1 %v278_v37 }
  0xb4   : > { %668 = vmatmul.bf16.gmra.mxu2 %v278_v37 }
  0xc2   : > { %495 = vmatmul.bf16.gmra.mxu0 %v279_v40  ;;  %624 = vmatmul.bf16.gmra.mxu3 %v2839_v28 }
  0xc3   : > { %584 = vmatmul.bf16.gmra.mxu1 %v279_v40 }
  0xc4   : > { %673 = vmatmul.bf16.gmra.mxu2 %v279_v40 }
  0xd2   : > { %500 = vmatmul.bf16.gmra.mxu0 %v280_v43  ;;  %629 = vmatmul.bf16.gmra.mxu3 %v2850_v34 }
  0xd3   : > { %589 = vmatmul.bf16.gmra.mxu1 %v280_v43 }
  0xd4   : > { %678 = vmatmul.bf16.gmra.mxu2 %v280_v43 }
  0xdf   : > { %v466_v50 = vpop.f32.mrf.mxu0 }
  0xe0   : > { %v467_v51 = vadd.f32 %v466_v50, %v2870_v47  ;;  %v555_v52 = vpop.f32.mrf.mxu1  ;;  %v284_v50 = vpack.c.bf16 %v264_v45, %v263_v44 }
  0xe1   : > { %v556_v53 = vadd.f32 %v555_v52, %v2872_v48 }
  0xe2   : > { %505 = vmatmul.bf16.gmra.mxu0 %v281_v49  ;;  %703 = vmatmul.bf16.vlgmr.msra.gmra.mxu3 %v2820_v15 }
  0xe3   : > { %v724_v54 = vpack.c.bf16 %v556_v53, %v467_v51  ;;  %594 = vmatmul.bf16.gmra.mxu1 %v281_v49 }
  0xe4   : > { %683 = vmatmul.bf16.gmra.mxu2 %v281_v49 }
  0xe5   : > { %788 = vst [vmem:[#allocation2] sm:$0xff] %v724_v54  ;;  %v2879_v56 = vpop.f32.mrf.mxu3 }
  0xe7   : > { %v644_v57 = vpop.f32.mrf.mxu2  ;;  %v468_v59 = vpop.f32.mrf.mxu0 }
  0xe8   : > { %v645_v58 = vadd.f32 %v644_v57, %v2877_v55  ;;  %v469_v60 = vadd.f32 %v468_v59, %v2870_v47  ;;  %v557_v61 = vpop.f32.mrf.mxu1 }
  0xe9   : > { %v558_v63 = vadd.f32 %v557_v61, %v2872_v48 }
  0xea   : > { %v725_v62 = vpack.c.bf16 %v645_v58, %v645_v58 }
  0xeb   : > { %v726_v0 = vpack.c.bf16 %v558_v63, %v469_v60 }
  0xec   : > { %789 = vst [vmem:[#allocation2 + $0x8] sm:$0xf] %v725_v62 }
  0xed   : > { %790 = vst [vmem:[#allocation2 + $0xc] sm:$0xff] %v726_v0  ;;  %v2886_v3 = vpop.f32.mrf.mxu3 }
  0xef   : > { %v646_v4 = vpop.f32.mrf.mxu2  ;;  %v471_v9 = vpop.f32.mrf.mxu0 }
  0xf0   : > { %v647_v6 = vadd.f32 %v646_v4, %v2877_v55  ;;  %v472_v10 = vadd.f32 %v471_v9, %v2870_v47  ;;  %v560_v11 = vpop.f32.mrf.mxu1 }
  0xf1   : > { %v561_v13 = vadd.f32 %v560_v11, %v2872_v48 }
  0xf2   : > { %v727_v12 = vpack.c.bf16 %v647_v6, %v647_v6  ;;  %510 = vmatmul.bf16.gmra.mxu0 %v282_v5  ;;  %708 = vmatmul.bf16.gmra.mxu3 %v2831_v22 }
  0xf3   : > { %v728_v14 = vpack.c.bf16 %v561_v13, %v472_v10  ;;  %599 = vmatmul.bf16.gmra.mxu1 %v282_v5 }
  0xf4   : > { %791 = vst [vmem:[#allocation2 + $0x14] sm:$0xf] %v727_v12  ;;  %688 = vmatmul.bf16.gmra.mxu2 %v282_v5 }
  0xf5   : > { %792 = vst [vmem:[#allocation2 + $0x18] sm:$0xff] %v728_v14  ;;  %v2892_v15 = vpop.f32.mrf.mxu3 }
  0xf7   : > { %v649_v18 = vpop.f32.mrf.mxu2  ;;  %v473_v20 = vpop.f32.mrf.mxu0 }
  0xf8   : > { %v650_v19 = vadd.f32 %v649_v18, %v2877_v55  ;;  %v474_v21 = vadd.f32 %v473_v20, %v2870_v47  ;;  %v562_v7 = vpop.f32.mrf.mxu1  ;;  %v527_v20 = vadd.f32 %v2879_v56, %v2870_v47  ;;  %v529_v56 = vadd.f32 %v2886_v3, %v2870_v47 }
  0xf9   : > { %v563_v23 = vadd.f32 %v562_v7, %v2872_v48  ;;  %v532_v3 = vadd.f32 %v2892_v15, %v2870_v47 }
  0xfa   : > { %v729_v16 = vpack.c.bf16 %v650_v19, %v650_v19 }
  0xfb   : > { %v730_v22 = vpack.c.bf16 %v563_v23, %v474_v21 }
  0xfc   : > { %793 = vst [vmem:[#allocation2 + $0x20] sm:$0xf] %v729_v16 }
  0xfd   : > { %794 = vst [vmem:[#allocation2 + $0x24] sm:$0xff] %v730_v22  ;;  %v2899_v27 = vpop.f32.mrf.mxu3 }
  0xfe   : > { %v534_v15 = vadd.f32 %v2899_v27, %v2870_v47 }
  0xff   : > { %v651_v29 = vpop.f32.mrf.mxu2  ;;  %v476_v32 = vpop.f32.mrf.mxu0 }
 0x100   : > { %v652_v31 = vadd.f32 %v651_v29, %v2877_v55  ;;  %v477_v33 = vadd.f32 %v476_v32, %v2870_v47  ;;  %v565_v8 = vpop.f32.mrf.mxu1 }
 0x101   : > { %v566_v26 = vadd.f32 %v565_v8, %v2872_v48 }
 0x102   : > { %v731_v17 = vpack.c.bf16 %v652_v31, %v652_v31  ;;  %515 = vmatmul.bf16.gmra.mxu0 %v283_v30  ;;  %713 = vmatmul.bf16.gmra.mxu3 %v2839_v28 }
 0x103   : > { %v732_v35 = vpack.c.bf16 %v566_v26, %v477_v33  ;;  %604 = vmatmul.bf16.gmra.mxu1 %v283_v30 }
 0x104   : > { %795 = vst [vmem:[#allocation2 + $0x2c] sm:$0xf] %v731_v17  ;;  %693 = vmatmul.bf16.gmra.mxu2 %v283_v30 }
 0x105   : > { %796 = vst [vmem:[#allocation2 + $0x30] sm:$0xff] %v732_v35  ;;  %v2905_v36 = vpop.f32.mrf.mxu3 }
 0x106   : > { %v537_v27 = vadd.f32 %v2905_v36, %v2870_v47 }
 0x107   : > { %v654_v37 = vpop.f32.mrf.mxu2  ;;  %v478_v39 = vpop.f32.mrf.mxu0 }
 0x108   : > { %v655_v38 = vadd.f32 %v654_v37, %v2877_v55  ;;  %v479_v40 = vadd.f32 %v478_v39, %v2870_v47  ;;  %v567_v41 = vpop.f32.mrf.mxu1 }
 0x109   : > { %v568_v43 = vadd.f32 %v567_v41, %v2872_v48 }
 0x10a   : > { %v733_v42 = vpack.c.bf16 %v655_v38, %v655_v38 }
 0x10b   : > { %v734_v28 = vpack.c.bf16 %v568_v43, %v479_v40 }
 0x10c   : > { %797 = vst [vmem:[#allocation2 + $0x38] sm:$0xf] %v733_v42 }
 0x10d   : > { %798 = vst [vmem:[#allocation2 + $0x3c] sm:$0xff] %v734_v28  ;;  %v2912_v46 = vpop.f32.mrf.mxu3 }
 0x10e   : > { %v539_v36 = vadd.f32 %v2912_v46, %v2870_v47 }
 0x10f   : > { %v656_v49 = vpop.f32.mrf.mxu2  ;;  %v481_v52 = vpop.f32.mrf.mxu0 }
 0x110   : > { %v657_v51 = vadd.f32 %v656_v49, %v2877_v55  ;;  %v482_v53 = vadd.f32 %v481_v52, %v2870_v47  ;;  %v570_v54 = vpop.f32.mrf.mxu1 }
 0x111   : > { %v571_v58 = vadd.f32 %v570_v54, %v2872_v48 }
 0x112   : > { %v735_v57 = vpack.c.bf16 %v657_v51, %v657_v51  ;;  %520 = vmatmul.bf16.gmra.mxu0 %v284_v50  ;;  %718 = vmatmul.bf16.gmra.mxu3 %v2850_v34 }
 0x113   : > { %v736_v59 = vpack.c.bf16 %v571_v58, %v482_v53  ;;  %609 = vmatmul.bf16.gmra.mxu1 %v284_v50 }
 0x114   : > { %799 = vst [vmem:[#allocation2 + $0x44] sm:$0xf] %v735_v57  ;;  %698 = vmatmul.bf16.gmra.mxu2 %v284_v50 }
 0x115   : > { %800 = vst [vmem:[#allocation2 + $0x48] sm:$0xff] %v736_v59  ;;  %v2918_v60 = vpop.f32.mrf.mxu3 }
 0x116   : > { %v542_v46 = vadd.f32 %v2918_v60, %v2870_v47 }
 0x117   : > { %v659_v61 = vpop.f32.mrf.mxu2  ;;  %v483_v63 = vpop.f32.mrf.mxu0 }
 0x118   : > { %v660_v62 = vadd.f32 %v659_v61, %v2877_v55  ;;  %v484_v0 = vadd.f32 %v483_v63, %v2870_v47  ;;  %v572_v1 = vpop.f32.mrf.mxu1 }
 0x119   : > { %v573_v4 = vadd.f32 %v572_v1, %v2872_v48 }
 0x11a   : > { %v737_v2 = vpack.c.bf16 %v660_v62, %v660_v62 }
 0x11b   : > { %v738_v5 = vpack.c.bf16 %v573_v4, %v484_v0 }
 0x11c   : > { %801 = vst [vmem:[#allocation2 + $0x50] sm:$0xf] %v737_v2 }
 0x11d   : > { %802 = vst [vmem:[#allocation2 + $0x54] sm:$0xff] %v738_v5  ;;  %v2923_v34 = vpop.f32.mrf.mxu3 }
 0x11e   : > { %v544_v60 = vadd.f32 %v2923_v34, %v2870_v47 }
 0x11f   : > { %v661_v6 = vpop.f32.mrf.mxu2  ;;  %v486_v10 = vpop.f32.mrf.mxu0 }
 0x120   : > { %v662_v9 = vadd.f32 %v661_v6, %v2877_v55  ;;  %v487_v11 = vadd.f32 %v486_v10, %v2870_v47  ;;  %v575_v12 = vpop.f32.mrf.mxu1 }
 0x121   : > { %v576_v14 = vadd.f32 %v575_v12, %v2872_v48 }
 0x122   : > { %v739_v13 = vpack.c.bf16 %v662_v9, %v662_v9 }
 0x123   : > { %v740_v18 = vpack.c.bf16 %v576_v14, %v487_v11 }
 0x124   : > { %803 = vst [vmem:[#allocation2 + $0x5c] sm:$0xf] %v739_v13 }
 0x125   : > { %804 = vst [vmem:[#allocation2 + $0x60] sm:$0xff] %v740_v18  ;;  %v615_v19 = vpop.f32.mrf.mxu3 }
 0x126   : > { %v616_v21 = vadd.f32 %v615_v19, %v2872_v48 }
 0x127   : > { %v664_v7 = vpop.f32.mrf.mxu2  ;;  %v488_v23 = vpop.f32.mrf.mxu0 }
 0x128   : > { %v665_v16 = vadd.f32 %v664_v7, %v2877_v55  ;;  %v772_v22 = vpack.c.bf16 %v616_v21, %v527_v20  ;;  %v489_v24 = vadd.f32 %v488_v23, %v2870_v47  ;;  %v577_v25 = vpop.f32.mrf.mxu1 }
 0x129   : > { %v578_v30 = vadd.f32 %v577_v25, %v2872_v48 }
 0x12a   : > { %v741_v29 = vpack.c.bf16 %v665_v16, %v665_v16  ;;  %836 = vst [vmem:[#allocation2 + $0x120] sm:$0xff] %v772_v22 }
 0x12b   : > { %v742_v31 = vpack.c.bf16 %v578_v30, %v489_v24 }
 0x12c   : > { %805 = vst [vmem:[#allocation2 + $0x68] sm:$0xf] %v741_v29 }
 0x12d   : > { %806 = vst [vmem:[#allocation2 + $0x6c] sm:$0xff] %v742_v31  ;;  %v617_v32 = vpop.f32.mrf.mxu3 }
 0x12e   : > { %v618_v33 = vadd.f32 %v617_v32, %v2872_v48 }
 0x12f   : > { %v666_v8 = vpop.f32.mrf.mxu2  ;;  %v491_v26 = vpop.f32.mrf.mxu0 }
 0x130   : > { %v667_v17 = vadd.f32 %v666_v8, %v2877_v55  ;;  %v774_v35 = vpack.c.bf16 %v618_v33, %v529_v56  ;;  %v492_v37 = vadd.f32 %v491_v26, %v2870_v47  ;;  %v580_v38 = vpop.f32.mrf.mxu1 }
 0x131   : > { %v581_v40 = vadd.f32 %v580_v38, %v2872_v48 }
 0x132   : > { %v743_v39 = vpack.c.bf16 %v667_v17, %v667_v17  ;;  %838 = vst [vmem:[#allocation2 + $0x12c] sm:$0xff] %v774_v35 }
 0x133   : > { %v744_v41 = vpack.c.bf16 %v581_v40, %v492_v37 }
 0x134   : > { %807 = vst [vmem:[#allocation2 + $0x74] sm:$0xf] %v743_v39 }
 0x135   : > { %808 = vst [vmem:[#allocation2 + $0x78] sm:$0xff] %v744_v41  ;;  %v620_v42 = vpop.f32.mrf.mxu3 }
 0x136   : > { %v621_v43 = vadd.f32 %v620_v42, %v2872_v48 }
 0x137   : > { %v669_v28 = vpop.f32.mrf.mxu2  ;;  %v493_v45 = vpop.f32.mrf.mxu0 }
 0x138   : > { %v670_v44 = vadd.f32 %v669_v28, %v2877_v55  ;;  %v776_v49 = vpack.c.bf16 %v621_v43, %v532_v3  ;;  %v494_v50 = vadd.f32 %v493_v45, %v2870_v47  ;;  %v582_v51 = vpop.f32.mrf.mxu1 }
 0x139   : > { %v583_v53 = vadd.f32 %v582_v51, %v2872_v48 }
 0x13a   : > { %v745_v52 = vpack.c.bf16 %v670_v44, %v670_v44  ;;  %840 = vst [vmem:[#allocation2 + $0x138] sm:$0xff] %v776_v49 }
 0x13b   : > { %v746_v54 = vpack.c.bf16 %v583_v53, %v494_v50 }
 0x13c   : > { %809 = vst [vmem:[#allocation2 + $0x80] sm:$0xf] %v745_v52 }
 0x13d   : > { %810 = vst [vmem:[#allocation2 + $0x84] sm:$0xff] %v746_v54  ;;  %v622_v57 = vpop.f32.mrf.mxu3 }
 0x13e   : > { %v623_v58 = vadd.f32 %v622_v57, %v2872_v48 }
 0x13f   : > { %v671_v59 = vpop.f32.mrf.mxu2  ;;  %v496_v62 = vpop.f32.mrf.mxu0 }
 0x140   : > { %v672_v61 = vadd.f32 %v671_v59, %v2877_v55  ;;  %v778_v63 = vpack.c.bf16 %v623_v58, %v534_v15  ;;  %v497_v0 = vadd.f32 %v496_v62, %v2870_v47  ;;  %v585_v1 = vpop.f32.mrf.mxu1 }
 0x141   : > { %v586_v4 = vadd.f32 %v585_v1, %v2872_v48 }
 0x142   : > { %v747_v2 = vpack.c.bf16 %v672_v61, %v672_v61  ;;  %842 = vst [vmem:[#allocation2 + $0x144] sm:$0xff] %v778_v63 }
 0x143   : > { %v748_v5 = vpack.c.bf16 %v586_v4, %v497_v0 }
 0x144   : > { %811 = vst [vmem:[#allocation2 + $0x8c] sm:$0xf] %v747_v2 }
 0x145   : > { %812 = vst [vmem:[#allocation2 + $0x90] sm:$0xff] %v748_v5  ;;  %v625_v6 = vpop.f32.mrf.mxu3 }
 0x146   : > { %v626_v9 = vadd.f32 %v625_v6, %v2872_v48 }
 0x147   : > { %v674_v10 = vpop.f32.mrf.mxu2  ;;  %v498_v12 = vpop.f32.mrf.mxu0 }
 0x148   : > { %v675_v11 = vadd.f32 %v674_v10, %v2877_v55  ;;  %v780_v13 = vpack.c.bf16 %v626_v9, %v537_v27  ;;  %v499_v14 = vadd.f32 %v498_v12, %v2870_v47  ;;  %v587_v18 = vpop.f32.mrf.mxu1 }
 0x149   : > { %v588_v20 = vadd.f32 %v587_v18, %v2872_v48 }
 0x14a   : > { %v749_v19 = vpack.c.bf16 %v675_v11, %v675_v11  ;;  %844 = vst [vmem:[#allocation2 + $0x150] sm:$0xff] %v780_v13 }
 0x14b   : > { %v750_v21 = vpack.c.bf16 %v588_v20, %v499_v14 }
 0x14c   : > { %813 = vst [vmem:[#allocation2 + $0x98] sm:$0xf] %v749_v19 }
 0x14d   : > { %814 = vst [vmem:[#allocation2 + $0x9c] sm:$0xff] %v750_v21  ;;  %v627_v7 = vpop.f32.mrf.mxu3 }
 0x14e   : > { %v628_v16 = vadd.f32 %v627_v7, %v2872_v48 }
 0x14f   : > { %v676_v23 = vpop.f32.mrf.mxu2  ;;  %v501_v24 = vpop.f32.mrf.mxu0 }
 0x150   : > { %v677_v22 = vadd.f32 %v676_v23, %v2877_v55  ;;  %v782_v25 = vpack.c.bf16 %v628_v16, %v539_v36  ;;  %v502_v29 = vadd.f32 %v501_v24, %v2870_v47  ;;  %v590_v30 = vpop.f32.mrf.mxu1 }
 0x151   : > { %v591_v32 = vadd.f32 %v590_v30, %v2872_v48 }
 0x152   : > { %v751_v31 = vpack.c.bf16 %v677_v22, %v677_v22  ;;  %846 = vst [vmem:[#allocation2 + $0x15c] sm:$0xff] %v782_v25 }
 0x153   : > { %v752_v56 = vpack.c.bf16 %v591_v32, %v502_v29 }
 0x154   : > { %815 = vst [vmem:[#allocation2 + $0xa4] sm:$0xf] %v751_v31 }
 0x155   : > { %816 = vst [vmem:[#allocation2 + $0xa8] sm:$0xff] %v752_v56  ;;  %v630_v33 = vpop.f32.mrf.mxu3 }
 0x156   : > { %v631_v8 = vadd.f32 %v630_v33, %v2872_v48 }
 0x157   : > { %v679_v17 = vpop.f32.mrf.mxu2  ;;  %v503_v35 = vpop.f32.mrf.mxu0 }
 0x158   : > { %v680_v26 = vadd.f32 %v679_v17, %v2877_v55  ;;  %v784_v37 = vpack.c.bf16 %v631_v8, %v542_v46  ;;  %v504_v38 = vadd.f32 %v503_v35, %v2870_v47  ;;  %v592_v39 = vpop.f32.mrf.mxu1 }
 0x159   : > { %v593_v41 = vadd.f32 %v592_v39, %v2872_v48 }
 0x15a   : > { %v753_v40 = vpack.c.bf16 %v680_v26, %v680_v26  ;;  %848 = vst [vmem:[#allocation2 + $0x168] sm:$0xff] %v784_v37 }
 0x15b   : > { %v754_v42 = vpack.c.bf16 %v593_v41, %v504_v38 }
 0x15c   : > { %817 = vst [vmem:[#allocation2 + $0xb0] sm:$0xf] %v753_v40 }
 0x15d   : > { %818 = vst [vmem:[#allocation2 + $0xb4] sm:$0xff] %v754_v42  ;;  %v632_v3 = vpop.f32.mrf.mxu3 }
 0x15e   : > { %v633_v43 = vadd.f32 %v632_v3, %v2872_v48 }
 0x15f   : > { %v681_v28 = vpop.f32.mrf.mxu2  ;;  %v506_v45 = vpop.f32.mrf.mxu0 }
 0x160   : > { %v682_v44 = vadd.f32 %v681_v28, %v2877_v55  ;;  %v786_v49 = vpack.c.bf16 %v633_v43, %v544_v60  ;;  %v507_v50 = vadd.f32 %v506_v45, %v2870_v47  ;;  %v595_v51 = vpop.f32.mrf.mxu1 }
 0x161   : > { %v596_v53 = vadd.f32 %v595_v51, %v2872_v48 }
 0x162   : > { %v755_v52 = vpack.c.bf16 %v682_v44, %v682_v44  ;;  %850 = vst [vmem:[#allocation2 + $0x174] sm:$0xff] %v786_v49 }
 0x163   : > { %v756_v54 = vpack.c.bf16 %v596_v53, %v507_v50 }
 0x164   : > { %819 = vst [vmem:[#allocation2 + $0xbc] sm:$0xf] %v755_v52 }
 0x165   : > { %820 = vst [vmem:[#allocation2 + $0xc0] sm:$0xff] %v756_v54  ;;  %v704_v57 = vpop.f32.mrf.mxu3 }
 0x166   : > { %v705_v34 = vadd.f32 %v704_v57, %v2877_v55 }
 0x167   : > { %v684_v15 = vpop.f32.mrf.mxu2  ;;  %v508_v59 = vpop.f32.mrf.mxu0 }
 0x168   : > { %v685_v58 = vadd.f32 %v684_v15, %v2877_v55  ;;  %v773_v61 = vpack.c.bf16 %v705_v34, %v705_v34  ;;  %v509_v62 = vadd.f32 %v508_v59, %v2870_v47  ;;  %v597_v63 = vpop.f32.mrf.mxu1 }
 0x169   : > { %v598_v1 = vadd.f32 %v597_v63, %v2872_v48 }
 0x16a   : > { %v757_v0 = vpack.c.bf16 %v685_v58, %v685_v58  ;;  %837 = vst [vmem:[#allocation2 + $0x128] sm:$0xf] %v773_v61 }
 0x16b   : > { %v758_v2 = vpack.c.bf16 %v598_v1, %v509_v62 }
 0x16c   : > { %821 = vst [vmem:[#allocation2 + $0xc8] sm:$0xf] %v757_v0 }
 0x16d   : > { %822 = vst [vmem:[#allocation2 + $0xcc] sm:$0xff] %v758_v2  ;;  %v706_v4 = vpop.f32.mrf.mxu3 }
 0x16e   : > { %v707_v6 = vadd.f32 %v706_v4, %v2877_v55 }
 0x16f   : > { %v686_v5 = vpop.f32.mrf.mxu2  ;;  %v511_v9 = vpop.f32.mrf.mxu0 }
 0x170   : > { %v687_v27 = vadd.f32 %v686_v5, %v2877_v55  ;;  %v775_v10 = vpack.c.bf16 %v707_v6, %v707_v6  ;;  %v512_v11 = vadd.f32 %v511_v9, %v2870_v47  ;;  %v600_v12 = vpop.f32.mrf.mxu1 }
 0x171   : > { %v601_v14 = vadd.f32 %v600_v12, %v2872_v48 }
 0x172   : > { %v759_v13 = vpack.c.bf16 %v687_v27, %v687_v27  ;;  %839 = vst [vmem:[#allocation2 + $0x134] sm:$0xf] %v775_v10 }
 0x173   : > { %v760_v18 = vpack.c.bf16 %v601_v14, %v512_v11 }
 0x174   : > { %823 = vst [vmem:[#allocation2 + $0xd4] sm:$0xf] %v759_v13 }
 0x175   : > { %824 = vst [vmem:[#allocation2 + $0xd8] sm:$0xff] %v760_v18  ;;  %v709_v19 = vpop.f32.mrf.mxu3 }
 0x176   : > { %v710_v21 = vadd.f32 %v709_v19, %v2877_v55 }
 0x177   : > { %v689_v20 = vpop.f32.mrf.mxu2  ;;  %v513_v36 = vpop.f32.mrf.mxu0 }
 0x178   : > { %v690_v7 = vadd.f32 %v689_v20, %v2877_v55  ;;  %v777_v16 = vpack.c.bf16 %v710_v21, %v710_v21  ;;  %v514_v23 = vadd.f32 %v513_v36, %v2870_v47  ;;  %v602_v22 = vpop.f32.mrf.mxu1 }
 0x179   : > { %v603_v25 = vadd.f32 %v602_v22, %v2872_v48 }
 0x17a   : > { %v761_v24 = vpack.c.bf16 %v690_v7, %v690_v7  ;;  %841 = vst [vmem:[#allocation2 + $0x140] sm:$0xf] %v777_v16 }
 0x17b   : > { %v762_v29 = vpack.c.bf16 %v603_v25, %v514_v23 }
 0x17c   : > { %825 = vst [vmem:[#allocation2 + $0xe0] sm:$0xf] %v761_v24 }
 0x17d   : > { %826 = vst [vmem:[#allocation2 + $0xe4] sm:$0xff] %v762_v29  ;;  %v711_v30 = vpop.f32.mrf.mxu3 }
 0x17e   : > { %v712_v32 = vadd.f32 %v711_v30, %v2877_v55 }
 0x17f   : > { %v691_v31 = vpop.f32.mrf.mxu2  ;;  %v516_v33 = vpop.f32.mrf.mxu0 }
 0x180   : > { %v692_v56 = vadd.f32 %v691_v31, %v2877_v55  ;;  %v779_v46 = vpack.c.bf16 %v712_v32, %v712_v32  ;;  %v517_v8 = vadd.f32 %v516_v33, %v2870_v47  ;;  %v605_v17 = vpop.f32.mrf.mxu1 }
 0x181   : > { %v606_v35 = vadd.f32 %v605_v17, %v2872_v48 }
 0x182   : > { %v763_v26 = vpack.c.bf16 %v692_v56, %v692_v56  ;;  %843 = vst [vmem:[#allocation2 + $0x14c] sm:$0xf] %v779_v46 }
 0x183   : > { %v764_v37 = vpack.c.bf16 %v606_v35, %v517_v8 }
 0x184   : > { %827 = vst [vmem:[#allocation2 + $0xec] sm:$0xf] %v763_v26 }
 0x185   : > { %828 = vst [vmem:[#allocation2 + $0xf0] sm:$0xff] %v764_v37  ;;  %v714_v38 = vpop.f32.mrf.mxu3 }
 0x186   : > { %v715_v40 = vadd.f32 %v714_v38, %v2877_v55 }
 0x187   : > { %v694_v39 = vpop.f32.mrf.mxu2  ;;  %v518_v42 = vpop.f32.mrf.mxu0 }
 0x188   : > { %v695_v41 = vadd.f32 %v694_v39, %v2877_v55  ;;  %v781_v3 = vpack.c.bf16 %v715_v40, %v715_v40  ;;  %v519_v60 = vadd.f32 %v518_v42, %v2870_v47  ;;  %v607_v43 = vpop.f32.mrf.mxu1 }
 0x189   : > { %v608_v44 = vadd.f32 %v607_v43, %v2872_v48 }
 0x18a   : > { %v765_v28 = vpack.c.bf16 %v695_v41, %v695_v41  ;;  %845 = vst [vmem:[#allocation2 + $0x158] sm:$0xf] %v781_v3 }
 0x18b   : > { %v766_v45 = vpack.c.bf16 %v608_v44, %v519_v60 }
 0x18c   : > { %829 = vst [vmem:[#allocation2 + $0xf8] sm:$0xf] %v765_v28 }
 0x18d   : > { %830 = vst [vmem:[#allocation2 + $0xfc] sm:$0xff] %v766_v45  ;;  %v716_v49 = vpop.f32.mrf.mxu3 }
 0x18e   : > { %v717_v51 = vadd.f32 %v716_v49, %v2877_v55 }
 0x18f   : > { %v696_v50 = vpop.f32.mrf.mxu2  ;;  %v521_v53 = vpop.f32.mrf.mxu0 }
 0x190   : > { %v697_v52 = vadd.f32 %v696_v50, %v2877_v55  ;;  %v783_v54 = vpack.c.bf16 %v717_v51, %v717_v51  ;;  %v522_v57 = vadd.f32 %v521_v53, %v2870_v47  ;;  %v610_v15 = vpop.f32.mrf.mxu1 }
 0x191   : > { %v611_v58 = vadd.f32 %v610_v15, %v2872_v48 }
 0x192   : > { %v767_v34 = vpack.c.bf16 %v697_v52, %v697_v52  ;;  %847 = vst [vmem:[#allocation2 + $0x164] sm:$0xf] %v783_v54 }
 0x193   : > { %v768_v59 = vpack.c.bf16 %v611_v58, %v522_v57 }
 0x194   : > { %831 = vst [vmem:[#allocation2 + $0x104] sm:$0xf] %v767_v34 }
 0x195   : > { %832 = vst [vmem:[#allocation2 + $0x108] sm:$0xff] %v768_v59  ;;  %v719_v61 = vpop.f32.mrf.mxu3 }
 0x196   : > { %v720_v63 = vadd.f32 %v719_v61, %v2877_v55 }
 0x197   : > { %v699_v62 = vpop.f32.mrf.mxu2  ;;  %v523_v1 = vpop.f32.mrf.mxu0 }
 0x198   : > { %v700_v0 = vadd.f32 %v699_v62, %v2877_v55  ;;  %v785_v2 = vpack.c.bf16 %v720_v63, %v720_v63  ;;  %v524_v4 = vadd.f32 %v523_v1, %v2870_v47  ;;  %v612_v5 = vpop.f32.mrf.mxu1 }
 0x199   : > { %v613_v27 = vadd.f32 %v612_v5, %v2872_v48 }
 0x19a   : > { %v769_v6 = vpack.c.bf16 %v700_v0, %v700_v0  ;;  %849 = vst [vmem:[#allocation2 + $0x170] sm:$0xf] %v785_v2 }
 0x19b   : > { %v770_v9 = vpack.c.bf16 %v613_v27, %v524_v4 }
 0x19c   : > { %833 = vst [vmem:[#allocation2 + $0x110] sm:$0xf] %v769_v6 }
 0x19d   : > { %834 = vst [vmem:[#allocation2 + $0x114] sm:$0xff] %v770_v9  ;;  %v721_v10 = vpop.f32.mrf.mxu3 }
 0x19e   : > { %v722_v12 = vadd.f32 %v721_v10, %v2877_v55 }
 0x19f   : > { %v701_v11 = vpop.f32.mrf.mxu2 }
 0x1a0   : > { %v702_v13 = vadd.f32 %v701_v11, %v2877_v55  ;;  %v787_v14 = vpack.c.bf16 %v722_v12, %v722_v12 }
 0x1a2   : > { %v771_v18 = vpack.c.bf16 %v702_v13, %v702_v13  ;;  %851 = vst [vmem:[#allocation2 + $0x17c] sm:$0xf] %v787_v14 }
 0x1a4   : > { %835 = vst [vmem:[#allocation2 + $0x11c] sm:$0xf] %v771_v18 }
 0x1a5 PF: > { %v1966_v47 = vld [vmem:[#allocation2 + $0xac] sm:$0xf]  ;;  %v2111_v19 = vld [vmem:[#allocation2 + $0xb4] sm:$0xf0]  ;;  %v1962_v36 = vld [vmem:[#allocation2 + $0x94] sm:$0xf] }
 0x1a6   : > { %v1998_v20 = vld [vmem:[#allocation2 + $0x16c] sm:$0xf]  ;;  %v1967_v21 = vor.u32 %v2111_v19, %v1966_v47  ;;  %v2119_v48 = vld [vmem:[#allocation2 + $0x174] sm:$0xf0]  ;;  %v2110_v16 = vld [vmem:[#allocation2 + $0x9c] sm:$0xf0] }
 0x1a7   : > { %v1999_v7 = vor.u32 %v2119_v48, %v1998_v20  ;;  %v1994_v23 = vld [vmem:[#allocation2 + $0x154] sm:$0xf]  ;;  %v2118_v22 = vld [vmem:[#allocation2 + $0x15c] sm:$0xf0]  ;;  %v1963_v24 = vor.u32 %v2110_v16, %v1962_v36  ;;  %v1958_v55 = vld [vmem:[#allocation2 + $0x7c] sm:$0xf] }
 0x1a8   : > { %1082 = vmatpush.bf16.xpose.msra.mxu0 %v1967_v21  ;;  %v1995_v25 = vor.u32 %v2118_v22, %v1994_v23  ;;  %v2109_v29 = vld [vmem:[#allocation2 + $0x84] sm:$0xf0]  ;;  %v1990_v30 = vld [vmem:[#allocation2 + $0x13c] sm:$0xf]  ;;  %v1954_v33 = vld [vmem:[#allocation2 + $0x64] sm:$0xf] }
 0x1a9   : > { %1131 = vmatpush.bf16.xpose.msra.mxu1 %v1999_v7  ;;  %v2117_v31 = vld [vmem:[#allocation2 + $0x144] sm:$0xf0]  ;;  %v1959_v32 = vor.u32 %v2109_v29, %v1958_v55  ;;  %v2108_v46 = vld [vmem:[#allocation2 + $0x6c] sm:$0xf0]  ;;  %v1986_v8 = vld [vmem:[#allocation2 + $0x124] sm:$0xf] }
 0x1aa   : > { %v1991_v56 = vor.u32 %v2117_v31, %v1990_v30  ;;  %v2116_v17 = vld [vmem:[#allocation2 + $0x12c] sm:$0xf0]  ;;  %v1955_v26 = vor.u32 %v2108_v46, %v1954_v33  ;;  %v1950_v37 = vld [vmem:[#allocation2 + $0x4c] sm:$0xf]  ;;  %v2107_v38 = vld [vmem:[#allocation2 + $0x54] sm:$0xf0] }
 0x1ab   : > { %v1987_v35 = vor.u32 %v2116_v17, %v1986_v8  ;;  %v1982_v39 = vld [vmem:[#allocation2 + $0x10c] sm:$0xf]  ;;  %v2115_v40 = vld [vmem:[#allocation2 + $0x114] sm:$0xf0]  ;;  %v1951_v41 = vor.u32 %v2107_v38, %v1950_v37  ;;  %v1946_v3 = vld [vmem:[#allocation2 + $0x34] sm:$0xf] }
 0x1ac   : > { %v1983_v42 = vor.u32 %v2115_v40, %v1982_v39  ;;  %v2106_v60 = vld [vmem:[#allocation2 + $0x3c] sm:$0xf0]  ;;  %v1978_v43 = vld [vmem:[#allocation2 + $0xf4] sm:$0xf]  ;;  %v1942_v49 = vld [vmem:[#allocation2 + $0x1c] sm:$0xf] }
 0x1ad   : > { %v2114_v28 = vld [vmem:[#allocation2 + $0xfc] sm:$0xf0]  ;;  %v1947_v44 = vor.u32 %v2106_v60, %v1946_v3  ;;  %v2105_v50 = vld [vmem:[#allocation2 + $0x24] sm:$0xf0]  ;;  %v1974_v51 = vld [vmem:[#allocation2 + $0xdc] sm:$0xf] }
 0x1ae   : > { %v1979_v45 = vor.u32 %v2114_v28, %v1978_v43  ;;  %v2113_v52 = vld [vmem:[#allocation2 + $0xe4] sm:$0xf0]  ;;  %s1902_s25 = sshll.u32 %s2585_s18, 7  ;;  %v1943_v53 = vor.u32 %v2105_v50, %v1942_v49  ;;  %v1938_v57 = vld [vmem:[#allocation2 + $0x4] sm:$0xf]  ;;  %s2065_s8 = sshll.u32 %s2585_s18, 4 }
 0x1af   : > { %v1975_v54 = vor.u32 %v2113_v52, %v1974_v51  ;;  %s853_s26 = sshra.s32 %s1902_s25, 3  ;;  %v2104_v15 = vld [vmem:[#allocation2 + $0xc] sm:$0xf0]  ;;  %v1970_v34 = vld [vmem:[#allocation2 + $0xc4] sm:$0xf]  ;;  %s3250_s7 = scalar_lea.vmem %s2764_s20, %s1902_s25 [#allocation3] }
 0x1b0   : > { %1083 = vmatpush.bf16.xpose.msra.mxu0 %v1963_v24  ;;  %s2095_s29 = smul.u32 12, %s853_s26  ;;  %v2112_v58 = vld [vmem:[#allocation2 + $0xcc] sm:$0xf0]  ;;  %v1939_v59 = vor.u32 %v2104_v15, %v1938_v57  ;;  %s2066_s9 = sshll.u32 %s2589_s19, 5 }
 0x1b1   : > { %1132 = vmatpush.bf16.xpose.msra.mxu1 %v1995_v25  ;;  %v1971_v61 = vor.u32 %v2112_v58, %v1970_v34  ;;  %s1675_s10 = sadd.s32 %s2066_s9, %s2065_s8  ;;  %s1678_s2 = sshll.u32 %s2777_s28, 4  ;;  %s1679_s2 = int_to_ptr.vmem [resolvable:$true] %s1678_s2 }
 0x1b2   : > { %s3009_s4 = scalar_lea.vmem [#allocation2], %s2095_s29  ;;  %s2067_s15 = sshll.u32 %s1675_s10, 3 }
 0x1b3   : > { %v1906_v62 = vld [vmem:[%s3009_s4] sm:$0xf]  ;;  %v2096_v63 = vld [vmem:[%s3009_s4 + $0x8] sm:$0xf0]  ;;  %v1910_v1 = vld [vmem:[%s3009_s4 + $0x18] sm:$0xf]  ;;  %s1677_s11 = scalar_lea.hbm %s3354_s3, %s2067_s15 }
 0x1b4   : > { %v1907_v0 = vor.u32 %v2096_v63, %v1906_v62  ;;  %v2097_v2 = vld [vmem:[%s3009_s4 + $0x20] sm:$0xf0]  ;;  %v1914_v5 = vld [vmem:[%s3009_s4 + $0x30] sm:$0xf]  ;;  %v2098_v6 = vld [vmem:[%s3009_s4 + $0x38] sm:$0xf0] }
 0x1b5   : > { %v1911_v4 = vor.u32 %v2097_v2, %v1910_v1  ;;  %v1915_v27 = vor.u32 %v2098_v6, %v1914_v5  ;;  %v1918_v9 = vld [vmem:[%s3009_s4 + $0x48] sm:$0xf]  ;;  %v2099_v10 = vld [vmem:[%s3009_s4 + $0x50] sm:$0xf0]  ;;  %v1922_v12 = vld [vmem:[%s3009_s4 + $0x60] sm:$0xf] }
 0x1b6   : > { %v1919_v11 = vor.u32 %v2099_v10, %v1918_v9  ;;  %v2100_v13 = vld [vmem:[%s3009_s4 + $0x68] sm:$0xf0]  ;;  %v1926_v18 = vld [vmem:[%s3009_s4 + $0x78] sm:$0xf]  ;;  %v2101_v47 = vld [vmem:[%s3009_s4 + $0x80] sm:$0xf0] }
 0x1b7   : > { %v1923_v14 = vor.u32 %v2100_v13, %v1922_v12  ;;  %v1927_v19 = vor.u32 %v2101_v47, %v1926_v18  ;;  %v1930_v20 = vld [vmem:[%s3009_s4 + $0x90] sm:$0xf]  ;;  %v2102_v21 = vld [vmem:[%s3009_s4 + $0x98] sm:$0xf0]  ;;  %v1934_v25 = vld [vmem:[%s3009_s4 + $0xa8] sm:$0xf] }
 0x1b8   : > { %1084 = vmatpush.bf16.xpose.msra.mxu0 %v1959_v32  ;;  %v1931_v48 = vor.u32 %v2102_v21, %v1930_v20  ;;  %v2103_v55 = vld [vmem:[%s3009_s4 + $0xb0] sm:$0xf0]  ;;  %s1680_s18 = sshll.u32 %s1677_s11, 4  ;;  %s1664_s19 = scalar_lea.sflag [#allocation5], %s233_s12  ;;  %s1681_s18 = int_to_ptr.hbm [resolvable:$true] %s1680_s18 }
 0x1b9   : > { %1133 = vmatpush.bf16.xpose.msra.mxu1 %v1991_v56  ;;  %v1935_v29 = vor.u32 %v2103_v55, %v1934_v25  ;;  %s2489_s30 = sshra.s32 %s1681_s18, 4  ;;  %s2495_s26 = scalar_lea.hbm %s3354_s3, 512  ;;  %s2490_s30 = int_to_ptr.hbm [resolvable:$true] %s2489_s30 }
 0x1ba   : > { %s2491_s20 = scalar_lea.hbm %s2490_s30, 128  ;;  %p2496_p2 = scmp.lt.s32.totalorder %s2490_s30, %s3354_s3 }
 0x1bb   : > { %p2492_p1 = scmp.ne.s32.totalorder %s2490_s30, %s2491_s20  ;;  %p2497_p3 = scmp.lt.s32.totalorder %s2495_s26, %s2491_s20 }
 0x1bd   : > { %p2493_p4 = pnand %p2492_p1, %p2701_p6  ;;  %p2498_p5 = por %p2497_p3, %p2496_p2 }
 0x1bf   : > { %p2494_p0 = pneg %p2493_p4 }
 0x1c0   : > { %1085 = vmatpush.bf16.xpose.msra.mxu0 %v1955_v26 }
 0x1c1   : > { %1134 = vmatpush.bf16.xpose.msra.mxu1 %v1987_v35  ;;  %p2499_p7 = pnand %p2498_p5, %p2494_p0 }
 0x1c8   : > { %1086 = vmatpush.bf16.xpose.msra.mxu0 %v1951_v41 }
 0x1c9   : > { %1135 = vmatpush.bf16.xpose.msra.mxu1 %v1983_v42 }
 0x1d0   : > { %1087 = vmatpush.bf16.xpose.msra.mxu0 %v1947_v44 }
 0x1d1   : > { %1136 = vmatpush.bf16.xpose.msra.mxu1 %v1979_v45 }
 0x1d8   : > { %1088 = vmatpush.bf16.xpose.msra.mxu0 %v1943_v53 }
 0x1d9   : > { %1137 = vmatpush.bf16.xpose.msra.mxu1 %v1975_v54 }
 0x1e0   : > { %1089 = vmatpush.bf16.xpose.msra.mxu0 %v1939_v59 }
 0x1e1   : > { %1138 = vmatpush.bf16.xpose.msra.mxu1 %v1971_v61 }
 0x1e7   : > { %1090 = vmatmul.bf16.vlgmr.msra.gmra.mxu0 %v1907_v0 }
 0x1e8   : > { %1139 = vmatmul.bf16.vlgmr.msra.gmra.mxu1 %v1907_v0 }
 0x1f7   : > { %1095 = vmatmul.bf16.gmra.mxu0 %v1911_v4 }
 0x1f8   : > { %1144 = vmatmul.bf16.gmra.mxu1 %v1911_v4 }
 0x207   : > { %1100 = vmatmul.bf16.gmra.mxu0 %v1915_v27 }
 0x208   : > { %1149 = vmatmul.bf16.gmra.mxu1 %v1915_v27 }
 0x217   : > { %1105 = vmatmul.bf16.gmra.mxu0 %v1919_v11 }
 0x218   : > { %1154 = vmatmul.bf16.gmra.mxu1 %v1919_v11 }
 0x227   : > { %1110 = vmatmul.bf16.gmra.mxu0 %v1923_v14 }
 0x228   : > { %1159 = vmatmul.bf16.gmra.mxu1 %v1923_v14 }
 0x237   : > { %1115 = vmatmul.bf16.gmra.mxu0 %v1927_v19 }
 0x238   : > { %1164 = vmatmul.bf16.gmra.mxu1 %v1927_v19 }
 0x247   : > { %1120 = vmatmul.bf16.gmra.mxu0 %v1931_v48 }
 0x248   : > { %1169 = vmatmul.bf16.gmra.mxu1 %v1931_v48 }
 0x257   : > { %1125 = vmatmul.bf16.gmra.mxu0 %v1935_v29 }
 0x258   : > { %1174 = vmatmul.bf16.gmra.mxu1 %v1935_v29 }
 0x264   : > { %v1091_v7 = vpop.f32.mrf.mxu0 }
 0x265   : > { %v1140_v36 = vpop.f32.mrf.mxu1 }
 0x266   : > { %v1180_v16 = vmax.f32 %v1091_v7, %v1140_v36 }
 0x268   : > { %1181 = vmax.xlane.f32.xlu0 %v1180_v16 }
 0x26c   : > { %v1093_v23 = vpop.f32.mrf.mxu0 }
 0x26d   : > { %v1142_v22 = vpop.f32.mrf.mxu1 }
 0x26e   : > { %v1183_v24 = vmax.f32 %v1093_v23, %v1142_v22 }
 0x270   : > { %1184 = vmax.xlane.f32.xlu0 %v1183_v24 }
 0x274   : > { %v1096_v30 = vpop.f32.mrf.mxu0 }
 0x275   : > { %v1145_v31 = vpop.f32.mrf.mxu1 }
 0x276   : > { %v1186_v32 = vmax.f32 %v1096_v30, %v1145_v31 }
 0x278   : > { %1187 = vmax.xlane.f32.xlu1 %v1186_v32 }
 0x27c   : > { %v3027_v56 = vpop.f32.mrf.mxu0 }
 0x27d   : > { %v3029_v33 = vpop.f32.mrf.mxu1 }
 0x27e   : > { %v1189_v46 = vmax.f32 %v3027_v56, %v3029_v33 }
 0x280   : > { %1190 = vmax.xlane.f32.xlu1 %v1189_v46 }
 0x284   : > { %v3033_v8 = vpop.f32.mrf.mxu0 }
 0x285   : > { %v3035_v17 = vpop.f32.mrf.mxu1 }
 0x286   : > { %v1192_v26 = vmax.f32 %v3033_v8, %v3035_v17 }
 0x288   : > { %1193 = vmax.xlane.f32.xlu2 %v1192_v26 }
 0x28c   : > { %v3039_v35 = vpop.f32.mrf.mxu0 }
 0x28d   : > { %v3041_v37 = vpop.f32.mrf.mxu1 }
 0x28e   : > { %v1195_v38 = vmax.f32 %v3039_v35, %v3041_v37 }
 0x290   : > { %1196 = vmax.xlane.f32.xlu2 %v1195_v38 }
 0x294   : > { %v3045_v39 = vpop.f32.mrf.mxu0 }
 0x295   : > { %v3047_v40 = vpop.f32.mrf.mxu1 }
 0x296   : > { %v1198_v41 = vmax.f32 %v3045_v39, %v3047_v40 }
 0x298   : > { %1199 = vmax.xlane.f32.xlu0 %v1198_v41 }
 0x29c   : > { %v3051_v42 = vpop.f32.mrf.mxu0 }
 0x29d   : > { %v3053_v3 = vpop.f32.mrf.mxu1 }
 0x29e   : > { %v1201_v60 = vmax.f32 %v3051_v42, %v3053_v3 }
 0x2a0   : > { %1202 = vmax.xlane.f32.xlu1 %v1201_v60 }
 0x2a4   : > { %v3057_v43 = vpop.f32.mrf.mxu0 }
 0x2a5   : > { %v3059_v28 = vpop.f32.mrf.mxu1 }
 0x2a6   : > { %v1204_v44 = vmax.f32 %v3057_v43, %v3059_v28 }
 0x2a8   : > { %1205 = vmax.xlane.f32.xlu1 %v1204_v44 }
 0x2ac   : > { %v3063_v53 = vpop.f32.mrf.mxu0 }
 0x2ad   : > { %v3065_v54 = vpop.f32.mrf.mxu1 }
 0x2ae   : > { %v1207_v12 = vmax.f32 %v3063_v53, %v3065_v54 }
 0x2b4   : > { %v3073_v0 = vpop.f32.mrf.mxu0 }
 0x2b5   : > { %v3075_v2 = vpop.f32.mrf.mxu1 }
 0x2bc   : > { %v3087_v47 = vpop.f32.mrf.mxu0 }
 0x2bd   : > { %v3089_v19 = vpop.f32.mrf.mxu1 }
 0x2c5   : > { %v3107_v32 = vpop.f32.mrf.mxu1 }
 0x2db   : > { %v1182_v45 = vpop.xlane.xlu0 %1181 }
 0x2dc   : > { %v1228_v49 = vsub.f32 %v1091_v7, %v1182_v45  ;;  %v1229_v50 = vsub.f32 %v1140_v36, %v1182_v45  ;;  %v1210_v7 = vmax.f32 %v3073_v0, %v3075_v2 }
 0x2de   : > { %v1260_v51 = vmul.f32 1.442695, %v1228_v49  ;;  %v1262_v52 = vmul.f32 1.442695, %v1229_v50  ;;  %v3125_v50 = vpop.f32.mrf.mxu1 }
 0x2e0   : > { %2289 = vpow2.f32 %v1260_v51  ;;  %v2062_v51 = vld [vmem:[#allocation2 + $0x170] sm:$0xf] }
 0x2e1   : > { %2291 = vpow2.f32 %v1262_v52 }
 0x2e3   : > { %v1185_v57 = vpop.xlane.xlu0 %1184 }
 0x2e4   : > { %v1230_v15 = vsub.f32 %v1093_v23, %v1185_v57  ;;  %v1231_v34 = vsub.f32 %v1142_v22, %v1185_v57 }
 0x2e6   : > { %v3067_v58 = vpop.eup %2289  ;;  %v1264_v59 = vmul.f32 1.442695, %v1230_v15  ;;  %v1266_v61 = vmul.f32 1.442695, %v1231_v34  ;;  %v2135_v15 = vld [vmem:[#allocation2 + $0x178] sm:$0xf0] }
 0x2e7   : > { %v3069_v62 = vpop.eup %2291  ;;  %v2026_v34 = vld [vmem:[#allocation2 + $0x98] sm:$0xf] }
 0x2e8   : > { %2293 = vpow2.f32 %v1264_v59  ;;  %v1324_v63 = vadd.f32 %v3069_v62, %v3067_v58  ;;  %v2126_v59 = vld [vmem:[#allocation2 + $0xa0] sm:$0xf0] }
 0x2e9   : > { %2295 = vpow2.f32 %v1266_v61 }
 0x2ea   : > { %1325 = vadd.xlane.f32.xlu2 %v1324_v63 }
 0x2eb   : > { %v1188_v1 = vpop.xlane.xlu1 %1187 }
 0x2ec   : > { %v1232_v4 = vsub.f32 %v1096_v30, %v1188_v1  ;;  %v1233_v5 = vsub.f32 %v1145_v31, %v1188_v1  ;;  %v3103_v30 = vpop.f32.mrf.mxu0  ;;  %v2063_v1 = vor.u32 %v2135_v15, %v2062_v51 }
 0x2ed   : > { %v1216_v60 = vmax.f32 %v3103_v30, %v3107_v32 }
 0x2ee   : > { %v3077_v6 = vpop.eup %2293  ;;  %v1268_v27 = vmul.f32 1.442695, %v1232_v4  ;;  %v1270_v9 = vmul.f32 1.442695, %v1233_v5  ;;  %v2058_v4 = vld [vmem:[#allocation2 + $0x158] sm:$0xf]  ;;  %1598 = vmatpush.bf16.msra.mxu3 %v2063_v1 }
 0x2ef   : > { %v3079_v10 = vpop.eup %2295  ;;  %v2134_v5 = vld [vmem:[#allocation2 + $0x160] sm:$0xf0]  ;;  %v2050_v1 = vld [vmem:[#allocation2 + $0x128] sm:$0xf] }
 0x2f0   : > { %2297 = vpow2.f32 %v1268_v27  ;;  %v1327_v11 = vadd.f32 %v3079_v10, %v3077_v6  ;;  %v2027_v27 = vor.u32 %v2126_v59, %v2026_v34 }
 0x2f1   : > { %2299 = vpow2.f32 %v1270_v9  ;;  %v2022_v9 = vld [vmem:[#allocation2 + $0x80] sm:$0xf] }
 0x2f2   : > { %1328 = vadd.xlane.f32.xlu0 %v1327_v11  ;;  %1208 = vmax.xlane.f32.xlu2 %v1207_v12 }
 0x2f3   : > { %v1191_v13 = vpop.xlane.xlu1 %1190 }
 0x2f4   : > { %v1234_v14 = vsub.f32 %v3027_v56, %v1191_v13  ;;  %v1235_v18 = vsub.f32 %v3029_v33, %v1191_v13  ;;  %v1213_v33 = vmax.f32 %v3087_v47, %v3089_v19  ;;  %v3121_v45 = vpop.f32.mrf.mxu0 }
 0x2f6   : > { %v3091_v20 = vpop.eup %2297  ;;  %v1272_v21 = vmul.f32 1.442695, %v1234_v14  ;;  %v1274_v48 = vmul.f32 1.442695, %v1235_v18  ;;  %v2125_v14 = vld [vmem:[#allocation2 + $0x88] sm:$0xf0] }
 0x2f7   : > { %v3095_v36 = vpop.eup %2299 }
 0x2f8   : > { %2301 = vpow2.f32 %v1272_v21  ;;  %v1330_v16 = vadd.f32 %v3095_v36, %v3091_v20  ;;  %v2059_v21 = vor.u32 %v2134_v5, %v2058_v4  ;;  %v2132_v5 = vld [vmem:[#allocation2 + $0x130] sm:$0xf0] }
 0x2f9   : > { %2303 = vpow2.f32 %v1274_v48  ;;  %v2054_v48 = vld [vmem:[#allocation2 + $0x140] sm:$0xf] }
 0x2fa   : > { %1331 = vadd.xlane.f32.xlu0 %v1330_v16  ;;  %1211 = vmax.xlane.f32.xlu2 %v1210_v7  ;;  %v2133_v7 = vld [vmem:[#allocation2 + $0x148] sm:$0xf0]  ;;  %v2023_v16 = vor.u32 %v2125_v14, %v2022_v9  ;;  %v2014_v9 = vld [vmem:[#allocation2 + $0x50] sm:$0xf] }
 0x2fb   : > { %v1194_v23 = vpop.xlane.xlu2 %1193  ;;  %1599 = vmatpush.bf16.msra.mxu3 %v2059_v21  ;;  %v2131_v21 = vld [vmem:[#allocation2 + $0x118] sm:$0xf0] }
 0x2fc   : > { %v1236_v22 = vsub.f32 %v3033_v8, %v1194_v23  ;;  %v1237_v24 = vsub.f32 %v3035_v17, %v1194_v23  ;;  %v3137_v23 = vpop.f32.mrf.mxu0 }
 0x2fe   : > { %v3101_v25 = vpop.eup %2301  ;;  %v1276_v55 = vmul.f32 1.442695, %v1236_v22  ;;  %v1278_v29 = vmul.f32 1.442695, %v1237_v24  ;;  %v3139_v22 = vpop.f32.mrf.mxu1 }
 0x2ff   : > { %v3105_v31 = vpop.eup %2303 }
 0x300   : > { %2305 = vpow2.f32 %v1276_v55  ;;  %v1333_v56 = vadd.f32 %v3105_v31, %v3101_v25  ;;  %v2055_v55 = vor.u32 %v2133_v7, %v2054_v48  ;;  %v2122_v48 = vld [vmem:[#allocation2 + $0x40] sm:$0xf0]  ;;  %v2042_v7 = vld [vmem:[#allocation2 + $0xf8] sm:$0xf] }
 0x301   : > { %2307 = vpow2.f32 %v1278_v29 }
 0x302   : > { %1334 = vadd.xlane.f32.xlu1 %v1333_v56  ;;  %1214 = vmax.xlane.f32.xlu0 %v1213_v33 }
 0x303   : > { %v1197_v46 = vpop.xlane.xlu2 %1196  ;;  %1600 = vmatpush.bf16.msra.mxu3 %v2055_v55 }
 0x304   : > { %v1238_v8 = vsub.f32 %v3039_v35, %v1197_v46  ;;  %v1239_v17 = vsub.f32 %v3041_v37, %v1197_v46  ;;  %v2030_v35 = vld [vmem:[#allocation2 + $0xb0] sm:$0xf]  ;;  %v2127_v37 = vld [vmem:[#allocation2 + $0xb8] sm:$0xf0] }
 0x305   : > { %v2031_v57 = vor.u32 %v2127_v37, %v2030_v35 }
 0x306   : > { %v3115_v26 = vpop.eup %2305  ;;  %v1280_v38 = vmul.f32 1.442695, %v1238_v8  ;;  %v1282_v41 = vmul.f32 1.442695, %v1239_v17  ;;  %v1222_v17 = vmax.f32 %v3137_v23, %v3139_v22  ;;  %v3155_v35 = vpop.f32.mrf.mxu1 }
 0x307   : > { %v3119_v44 = vpop.eup %2307  ;;  %1549 = vmatpush.bf16.msra.mxu2 %v2031_v57 }
 0x308   : > { %2309 = vpow2.f32 %v1280_v38  ;;  %v1336_v49 = vadd.f32 %v3119_v44, %v3115_v26 }
 0x309   : > { %2311 = vpow2.f32 %v1282_v41 }
 0x30a   : > { %1337 = vadd.xlane.f32.xlu1 %v1336_v49  ;;  %1217 = vmax.xlane.f32.xlu0 %v1216_v60  ;;  %v3153_v49 = vpop.f32.mrf.mxu0 }
 0x30b   : > { %v1200_v52 = vpop.xlane.xlu0 %1199  ;;  %1550 = vmatpush.bf16.msra.mxu2 %v2027_v27  ;;  %v1225_v15 = vmax.f32 %v3153_v49, %v3155_v35  ;;  %v2051_v27 = vor.u32 %v2132_v5, %v2050_v1 }
 0x30c   : > { %v1240_v61 = vsub.f32 %v3045_v39, %v1200_v52  ;;  %v1241_v63 = vsub.f32 %v3047_v40, %v1200_v52  ;;  %v1219_v40 = vmax.f32 %v3121_v45, %v3125_v50 }
 0x30d   : > { %1601 = vmatpush.bf16.msra.mxu3 %v2051_v27 }
 0x30e   : > { %v3129_v11 = vpop.eup %2309  ;;  %v1284_v12 = vmul.f32 1.442695, %v1240_v61  ;;  %v1286_v13 = vmul.f32 1.442695, %v1241_v63  ;;  %v2018_v61 = vld [vmem:[#allocation2 + $0x68] sm:$0xf] }
 0x30f   : > { %v3131_v18 = vpop.eup %2311  ;;  %1551 = vmatpush.bf16.msra.mxu2 %v2023_v16  ;;  %v2124_v63 = vld [vmem:[#allocation2 + $0x70] sm:$0xf0] }
 0x310   : > { %2313 = vpow2.f32 %v1284_v12  ;;  %v1339_v39 = vadd.f32 %v3131_v18, %v3129_v11  ;;  %v2019_v4 = vor.u32 %v2124_v63, %v2018_v61  ;;  %v2123_v12 = vld [vmem:[#allocation2 + $0x58] sm:$0xf0] }
 0x311   : > { %2315 = vpow2.f32 %v1286_v13  ;;  %v2046_v13 = vld [vmem:[#allocation2 + $0x110] sm:$0xf]  ;;  %v2015_v14 = vor.u32 %v2123_v12, %v2014_v9 }
 0x312   : > { %1340 = vadd.xlane.f32.xlu2 %v1339_v39  ;;  %1220 = vmax.xlane.f32.xlu1 %v1219_v40  ;;  %v2047_v39 = vor.u32 %v2131_v21, %v2046_v13  ;;  %v2010_v40 = vld [vmem:[#allocation2 + $0x38] sm:$0xf] }
 0x313   : > { %v1203_v24 = vpop.xlane.xlu1 %1202  ;;  %1552 = vmatpush.bf16.msra.mxu2 %v2019_v4  ;;  %v2011_v16 = vor.u32 %v2122_v48, %v2010_v40 }
 0x314   : > { %v1242_v29 = vsub.f32 %v3051_v42, %v1203_v24  ;;  %v1243_v56 = vsub.f32 %v3053_v3, %v1203_v24  ;;  %1602 = vmatpush.bf16.msra.mxu3 %v2047_v39  ;;  %v2130_v24 = vld [vmem:[#allocation2 + $0x100] sm:$0xf0] }
 0x315   : > { %v2043_v55 = vor.u32 %v2130_v24, %v2042_v7 }
 0x316   : > { %v3143_v33 = vpop.eup %2313  ;;  %v1288_v46 = vmul.f32 1.442695, %v1242_v29  ;;  %v1290_v8 = vmul.f32 1.442695, %v1243_v56  ;;  %v2006_v29 = vld [vmem:[#allocation2 + $0x20] sm:$0xf] }
 0x317   : > { %v3147_v38 = vpop.eup %2315  ;;  %1553 = vmatpush.bf16.msra.mxu2 %v2015_v14  ;;  %v2121_v56 = vld [vmem:[#allocation2 + $0x28] sm:$0xf0] }
 0x318   : > { %2317 = vpow2.f32 %v1288_v46  ;;  %v1342_v41 = vadd.f32 %v3147_v38, %v3143_v33  ;;  %1603 = vmatpush.bf16.msra.mxu3 %v2043_v55  ;;  %v2038_v46 = vld [vmem:[#allocation2 + $0xe0] sm:$0xf] }
 0x319   : > { %2319 = vpow2.f32 %v1290_v8  ;;  %v2007_v8 = vor.u32 %v2121_v56, %v2006_v29 }
 0x31a   : > { %1343 = vadd.xlane.f32.xlu2 %v1342_v41  ;;  %1223 = vmax.xlane.f32.xlu1 %v1222_v17  ;;  %v2129_v17 = vld [vmem:[#allocation2 + $0xe8] sm:$0xf0] }
 0x31b   : > { %v1206_v42 = vpop.xlane.xlu1 %1205  ;;  %1554 = vmatpush.bf16.msra.mxu2 %v2011_v16  ;;  %v2039_v41 = vor.u32 %v2129_v17, %v2038_v46 }
 0x31c   : > { %v1244_v3 = vsub.f32 %v3057_v43, %v1206_v42  ;;  %v1245_v60 = vsub.f32 %v3059_v28, %v1206_v42  ;;  %v2002_v42 = vld [vmem:[#allocation2 + $0x8] sm:$0xf] }
 0x31d   : > { %1604 = vmatpush.bf16.msra.mxu3 %v2039_v41 }
 0x31e   : > { %v3157_v37 = vpop.eup %2317  ;;  %v1292_v51 = vmul.f32 1.442695, %v1244_v3  ;;  %v1294_v52 = vmul.f32 1.442695, %v1245_v60  ;;  %v2120_v3 = vld [vmem:[#allocation2 + $0x10] sm:$0xf0] }
 0x31f   : > { %v3159_v57 = vpop.eup %2319  ;;  %1555 = vmatpush.bf16.msra.mxu2 %v2007_v8  ;;  %v2034_v60 = vld [vmem:[#allocation2 + $0xc8] sm:$0xf] }
 0x320   : > { %2321 = vpow2.f32 %v1292_v51  ;;  %v1345_v34 = vadd.f32 %v3159_v57, %v3157_v37  ;;  %v2003_v51 = vor.u32 %v2120_v3, %v2002_v42 }
 0x321   : > { %2323 = vpow2.f32 %v1294_v52  ;;  %v2128_v52 = vld [vmem:[#allocation2 + $0xd0] sm:$0xf0] }
 0x322   : > { %1346 = vadd.xlane.f32.xlu0 %v1345_v34  ;;  %1226 = vmax.xlane.f32.xlu2 %v1225_v15  ;;  %v2035_v15 = vor.u32 %v2128_v52, %v2034_v60 }
 0x323   : > { %1556 = vmatpush.bf16.msra.mxu2 %v2003_v51 }
 0x324   : > { %1605 = vmatpush.bf16.msra.mxu3 %v2035_v15 }
 0x326   : > { %v3165_v43 = vpop.eup %2321 }
 0x327   : > { %v3167_v28 = vpop.eup %2323 }
 0x328   : > { %v1348_v59 = vadd.f32 %v3167_v28, %v3165_v43 }
 0x32a   : > { %1349 = vadd.xlane.f32.xlu0 %v1348_v59 }
 0x35d   : > { %v1326_v34 = vpop.xlane.xlu2 %1325 }
 0x35e   : > { %2325 = vrcp.f32 %v1326_v34 }
 0x364   : > { %v2326_v27 = vpop.eup %2325 }
 0x365   : > { %v1329_v59 = vpop.xlane.xlu0 %1328  ;;  %v1209_v61 = vpop.xlane.xlu2 %1208  ;;  %v1388_v14 = vmul.f32 %v2326_v27, %v3067_v58  ;;  %v1389_v39 = vmul.f32 %v2326_v27, %v3069_v62 }
 0x366   : > { %2327 = vrcp.f32 %v1329_v59  ;;  %v1246_v63 = vsub.f32 %v3063_v53, %v1209_v61  ;;  %v1247_v1 = vsub.f32 %v3065_v54, %v1209_v61 }
 0x368   : > { %v1296_v4 = vmul.f32 1.442695, %v1246_v63  ;;  %v1298_v5 = vmul.f32 1.442695, %v1247_v1 }
 0x36a   : > { %2329 = vpow2.f32 %v1296_v4 }
 0x36b   : > { %2331 = vpow2.f32 %v1298_v5 }
 0x36c   : > { %v2328_v9 = vpop.eup %2327 }
 0x36d   : > { %v1332_v12 = vpop.xlane.xlu0 %1331  ;;  %v1212_v13 = vpop.xlane.xlu2 %1211  ;;  %v1390_v21 = vmul.f32 %v2328_v9, %v3077_v6  ;;  %v1391_v40 = vmul.f32 %v2328_v9, %v3079_v10 }
 0x36e   : > { %v1248_v53 = vsub.f32 %v3073_v0, %v1212_v13  ;;  %v1249_v54 = vsub.f32 %v3075_v2, %v1212_v13 }
 0x36f   : > { %v1420_v48 = vpack.c.bf16 %v1390_v21, %v1388_v14  ;;  %v1421_v7 = vpack.c.bf16 %v1391_v40, %v1389_v39 }
 0x370   : > { %v3179_v16 = vpop.eup %2329  ;;  %v1300_v24 = vmul.f32 1.442695, %v1248_v53  ;;  %v1302_v55 = vmul.f32 1.442695, %v1249_v54 }
 0x371   : > { %v3181_v29 = vpop.eup %2331  ;;  %1557 = vmatmul.bf16.vlgmr.msra.gmra.mxu2 %v1420_v48  ;;  %1606 = vmatmul.bf16.vlgmr.msra.gmra.mxu3 %v1421_v7 }
 0x372   : > { %2333 = vpow2.f32 %v1300_v24  ;;  %v1351_v58 = vadd.f32 %v3181_v29, %v3179_v16 }
 0x373   : > { %2335 = vpow2.f32 %v1302_v55 }
 0x374   : > { %2337 = vrcp.f32 %v1332_v12  ;;  %1352 = vadd.xlane.f32.xlu1 %v1351_v58 }
 0x375   : > { %v1335_v62 = vpop.xlane.xlu1 %1334  ;;  %v1215_v0 = vpop.xlane.xlu0 %1214 }
 0x376   : > { %2339 = vrcp.f32 %v1335_v62  ;;  %v1250_v2 = vsub.f32 %v3087_v47, %v1215_v0  ;;  %v1251_v6 = vsub.f32 %v3089_v19, %v1215_v0 }
 0x378   : > { %v3187_v10 = vpop.eup %2333  ;;  %v1304_v56 = vmul.f32 1.442695, %v1250_v2  ;;  %v1306_v46 = vmul.f32 1.442695, %v1251_v6 }
 0x379   : > { %v3189_v8 = vpop.eup %2335 }
 0x37a   : > { %v2338_v17 = vpop.eup %2337  ;;  %2341 = vpow2.f32 %v1304_v56  ;;  %v1354_v41 = vadd.f32 %v3189_v8, %v3187_v10 }
 0x37b   : > { %2343 = vpow2.f32 %v1306_v46  ;;  %v1392_v47 = vmul.f32 %v2338_v17, %v3091_v20  ;;  %v1393_v51 = vmul.f32 %v2338_v17, %v3095_v36 }
 0x37c   : > { %v2340_v42 = vpop.eup %2339  ;;  %1355 = vadd.xlane.f32.xlu2 %v1354_v41 }
 0x37d   : > { %v1338_v3 = vpop.xlane.xlu1 %1337  ;;  %v1218_v60 = vpop.xlane.xlu0 %1217  ;;  %v1394_v19 = vmul.f32 %v2340_v42, %v3101_v25  ;;  %v1395_v52 = vmul.f32 %v2340_v42, %v3105_v31 }
 0x37e   : > { %v1252_v15 = vsub.f32 %v3103_v30, %v1218_v60  ;;  %v1253_v34 = vsub.f32 %v3107_v32, %v1218_v60 }
 0x37f   : > { %v1422_v59 = vpack.c.bf16 %v1394_v19, %v1392_v47  ;;  %v1423_v61 = vpack.c.bf16 %v1395_v52, %v1393_v51 }
 0x380   : > { %v3199_v63 = vpop.eup %2341  ;;  %v1308_v1 = vmul.f32 1.442695, %v1252_v15  ;;  %v1310_v4 = vmul.f32 1.442695, %v1253_v34 }
 0x381   : > { %v3201_v5 = vpop.eup %2343  ;;  %1562 = vmatmul.bf16.gmra.mxu2 %v1422_v59  ;;  %1611 = vmatmul.bf16.gmra.mxu3 %v1423_v61 }
 0x382   : > { %2345 = vpow2.f32 %v1308_v1  ;;  %v1357_v20 = vadd.f32 %v3201_v5, %v3199_v63 }
 0x383   : > { %2347 = vpow2.f32 %v1310_v4 }
 0x384   : > { %2349 = vrcp.f32 %v1338_v3  ;;  %1358 = vadd.xlane.f32.xlu0 %v1357_v20 }
 0x385   : > { %v1341_v36 = vpop.xlane.xlu2 %1340  ;;  %v1221_v25 = vpop.xlane.xlu1 %1220 }
 0x386   : > { %2351 = vrcp.f32 %v1341_v36  ;;  %v1254_v30 = vsub.f32 %v3121_v45, %v1221_v25  ;;  %v1255_v31 = vsub.f32 %v3125_v50, %v1221_v25  ;;  %v1437_v25 = vld [vmem:[%s3250_s7] sm:$0xff] }
 0x388   : > { %v3207_v32 = vpop.eup %2345  ;;  %v1312_v27 = vmul.f32 1.442695, %v1254_v30  ;;  %v1314_v9 = vmul.f32 1.442695, %v1255_v31 }
 0x389   : > { %v3209_v12 = vpop.eup %2347 }
 0x38a   : > { %v2350_v13 = vpop.eup %2349  ;;  %2353 = vpow2.f32 %v1312_v27  ;;  %v1360_v14 = vadd.f32 %v3209_v12, %v3207_v32 }
 0x38b   : > { %2355 = vpow2.f32 %v1314_v9  ;;  %v1396_v45 = vmul.f32 %v2350_v13, %v3115_v26  ;;  %v1397_v53 = vmul.f32 %v2350_v13, %v3119_v44 }
 0x38c   : > { %v2352_v21 = vpop.eup %2351  ;;  %1361 = vadd.xlane.f32.xlu1 %v1360_v14 }
 0x38d   : > { %v1344_v39 = vpop.xlane.xlu2 %1343  ;;  %v1224_v40 = vpop.xlane.xlu1 %1223  ;;  %v1398_v50 = vmul.f32 %v2352_v21, %v3129_v11  ;;  %v1399_v54 = vmul.f32 %v2352_v21, %v3131_v18 }
 0x38e   : > { %v1256_v48 = vsub.f32 %v3137_v23, %v1224_v40  ;;  %v1257_v7 = vsub.f32 %v3139_v22, %v1224_v40 }
 0x38f   : > { %v1424_v24 = vpack.c.bf16 %v1398_v50, %v1396_v45  ;;  %v1425_v55 = vpack.c.bf16 %v1399_v54, %v1397_v53 }
 0x390   : > { %v3219_v58 = vpop.eup %2353  ;;  %v1316_v62 = vmul.f32 1.442695, %v1256_v48  ;;  %v1318_v0 = vmul.f32 1.442695, %v1257_v7 }
 0x391   : > { %v3221_v2 = vpop.eup %2355  ;;  %1567 = vmatmul.bf16.gmra.mxu2 %v1424_v24  ;;  %1616 = vmatmul.bf16.gmra.mxu3 %v1425_v55  ;;  %v1439_v24 = vld [vmem:[%s3250_s7 + $0x10] sm:$0xff] }
 0x392   : > { %2357 = vpow2.f32 %v1316_v62  ;;  %v1363_v26 = vadd.f32 %v3221_v2, %v3219_v58 }
 0x393   : > { %2359 = vpow2.f32 %v1318_v0 }
 0x394   : > { %2361 = vrcp.f32 %v1344_v39  ;;  %1364 = vadd.xlane.f32.xlu2 %v1363_v26 }
 0x395   : > { %v1347_v44 = vpop.xlane.xlu0 %1346  ;;  %v1227_v11 = vpop.xlane.xlu2 %1226 }
 0x396   : > { %2363 = vrcp.f32 %v1347_v44  ;;  %v1258_v18 = vsub.f32 %v3153_v49, %v1227_v11  ;;  %v1259_v23 = vsub.f32 %v3155_v35, %v1227_v11 }
 0x398   : > { %v3227_v22 = vpop.eup %2357  ;;  %v1320_v6 = vmul.f32 1.442695, %v1258_v18  ;;  %v1322_v56 = vmul.f32 1.442695, %v1259_v23 }
 0x399   : > { %v3229_v46 = vpop.eup %2359 }
 0x39a   : > { %v2362_v17 = vpop.eup %2361  ;;  %2365 = vpow2.f32 %v1320_v6  ;;  %v1366_v41 = vadd.f32 %v3229_v46, %v3227_v22 }
 0x39b   : > { %2367 = vpow2.f32 %v1322_v56  ;;  %v1400_v3 = vmul.f32 %v2362_v17, %v3143_v33  ;;  %v1401_v35 = vmul.f32 %v2362_v17, %v3147_v38 }
 0x39c   : > { %v2364_v42 = vpop.eup %2363  ;;  %1367 = vadd.xlane.f32.xlu0 %v1366_v41 }
 0x39d   : > { %v1402_v49 = vmul.f32 %v2364_v42, %v3157_v37  ;;  %v1403_v60 = vmul.f32 %v2364_v42, %v3159_v57  ;;  %v1350_v33 = vpop.xlane.xlu0 %1349 }
 0x39e   : > { %2369 = vrcp.f32 %v1350_v33 }
 0x39f   : > { %v1426_v47 = vpack.c.bf16 %v1402_v49, %v1400_v3  ;;  %v1427_v19 = vpack.c.bf16 %v1403_v60, %v1401_v35  ;;  %v1441_v35 = vld [vmem:[%s3250_s7 + $0x20] sm:$0xff] }
 0x3a0   : > { %v3237_v51 = vpop.eup %2365 }
 0x3a1   : > { %v3239_v52 = vpop.eup %2367  ;;  %1572 = vmatmul.bf16.gmra.mxu2 %v1426_v47  ;;  %1621 = vmatmul.bf16.gmra.mxu3 %v1427_v19 }
 0x3a2   : > { %v1369_v15 = vadd.f32 %v3239_v52, %v3237_v51 }
 0x3a4   : > { %1370 = vadd.xlane.f32.xlu1 %v1369_v15  ;;  %v2370_v38 = vpop.eup %2369 }
 0x3a5   : > { %v1404_v34 = vmul.f32 %v2370_v38, %v3165_v43  ;;  %v1405_v61 = vmul.f32 %v2370_v38, %v3167_v28 }
 0x3e7   : > { %v1353_v37 = vpop.xlane.xlu1 %1352 }
 0x3e8   : > { %2371 = vrcp.f32 %v1353_v37 }
 0x3ee   : > { %v2372_v57 = vpop.eup %2371 }
 0x3ef   : > { %v1406_v59 = vmul.f32 %v2372_v57, %v3179_v16  ;;  %v1407_v1 = vmul.f32 %v2372_v57, %v3181_v29  ;;  %v1356_v36 = vpop.xlane.xlu2 %1355  ;;  %v1438_v29 = vld [vmem:[%s3250_s7 + $0x8] sm:$0xff] }
 0x3f0   : > { %2373 = vrcp.f32 %v1356_v36  ;;  %v1443_v36 = vld [vmem:[%s3250_s7 + $0x30] sm:$0xff] }
 0x3f1   : > { %v1428_v4 = vpack.c.bf16 %v1406_v59, %v1404_v34  ;;  %v1429_v20 = vpack.c.bf16 %v1407_v1, %v1405_v61 }
 0x3f3   : > { %1577 = vmatmul.bf16.gmra.mxu2 %v1428_v4  ;;  %1626 = vmatmul.bf16.gmra.mxu3 %v1429_v20 }
 0x3f4   : > { %v1558_v30 = vpop.f32.mrf.mxu2  ;;  %v1607_v43 = vpop.f32.mrf.mxu3 }
 0x3f5   : > { %v1559_v16 = vadd.f32 %v1558_v30, %v1437_v25 }
 0x3f6   : > { %v2374_v27 = vpop.eup %2373 }
 0x3f7   : > { %v1608_v28 = vadd.f32 %v1607_v43, %v1559_v16  ;;  %v1359_v31 = vpop.xlane.xlu0 %1358  ;;  %v1408_v39 = vmul.f32 %v2374_v27, %v3187_v10  ;;  %v1409_v50 = vmul.f32 %v2374_v27, %v3189_v8  ;;  %v1440_v8 = vld [vmem:[%s3250_s7 + $0x18] sm:$0xff] }
 0x3f8   : > { %2375 = vrcp.f32 %v1359_v31  ;;  %v1445_v31 = vld [vmem:[%s3250_s7 + $0x40] sm:$0xff] }
 0x3f9   : > { %1647 = vst [vmem:[%s2777_s28] sm:$0xff] %v1608_v28 }
 0x3fc   : > { %v1560_v9 = vpop.f32.mrf.mxu2  ;;  %v1609_v13 = vpop.f32.mrf.mxu3 }
 0x3fd   : > { %v1561_v14 = vadd.f32 %v1560_v9, %v1438_v29 }
 0x3fe   : > { %v2376_v21 = vpop.eup %2375 }
 0x3ff   : > { %v1610_v40 = vadd.f32 %v1609_v13, %v1561_v14  ;;  %v1410_v45 = vmul.f32 %v2376_v21, %v3199_v63  ;;  %v1411_v53 = vmul.f32 %v2376_v21, %v3201_v5  ;;  %v1362_v7 = vpop.xlane.xlu1 %1361  ;;  %v1446_v14 = vld [vmem:[%s3250_s7 + $0x48] sm:$0xff] }
 0x400   : > { %2377 = vrcp.f32 %v1362_v7 }
 0x401   : > { %1648 = vst [vmem:[%s2777_s28 + $0x8] sm:$0xff] %v1610_v40  ;;  %v1430_v54 = vpack.c.bf16 %v1410_v45, %v1408_v39  ;;  %v1431_v48 = vpack.c.bf16 %v1411_v53, %v1409_v50  ;;  %v1447_v50 = vld [vmem:[%s3250_s7 + $0x50] sm:$0xff] }
 0x403   : > { %1582 = vmatmul.bf16.gmra.mxu2 %v1430_v54  ;;  %1631 = vmatmul.bf16.gmra.mxu3 %v1431_v48 }
 0x404   : > { %v1563_v55 = vpop.f32.mrf.mxu2  ;;  %v1612_v62 = vpop.f32.mrf.mxu3 }
 0x405   : > { %v1564_v10 = vadd.f32 %v1563_v55, %v1439_v24  ;;  %v1448_v24 = vld [vmem:[%s3250_s7 + $0x58] sm:$0xff] }
 0x406   : > { %v2378_v5 = vpop.eup %2377 }
 0x407   : > { %v1613_v0 = vadd.f32 %v1612_v62, %v1564_v10  ;;  %v1365_v63 = vpop.xlane.xlu2 %1364  ;;  %v1412_v23 = vmul.f32 %v2378_v5, %v3207_v32  ;;  %v1413_v17 = vmul.f32 %v2378_v5, %v3209_v12  ;;  %v1442_v12 = vld [vmem:[%s3250_s7 + $0x28] sm:$0xff] }
 0x408   : > { %2379 = vrcp.f32 %v1365_v63  ;;  %v1449_v63 = vld [vmem:[%s3250_s7 + $0x60] sm:$0xff] }
 0x409   : > { %1649 = vst [vmem:[%s2777_s28 + $0x10] sm:$0xff] %v1613_v0 }
 0x40c   : > { %v1565_v26 = vpop.f32.mrf.mxu2  ;;  %v1614_v44 = vpop.f32.mrf.mxu3 }
 0x40d   : > { %v1566_v11 = vadd.f32 %v1565_v26, %v1440_v8 }
 0x40e   : > { %v2380_v18 = vpop.eup %2379 }
 0x40f   : > { %v1615_v6 = vadd.f32 %v1614_v44, %v1566_v11  ;;  %v1414_v56 = vmul.f32 %v2380_v18, %v3219_v58  ;;  %v1415_v41 = vmul.f32 %v2380_v18, %v3221_v2  ;;  %v1368_v49 = vpop.xlane.xlu0 %1367  ;;  %v1450_v11 = vld [vmem:[%s3250_s7 + $0x68] sm:$0xff] }
 0x410   : > { %2381 = vrcp.f32 %v1368_v49 }
 0x411   : > { %1650 = vst [vmem:[%s2777_s28 + $0x18] sm:$0xff] %v1615_v6  ;;  %v1432_v42 = vpack.c.bf16 %v1414_v56, %v1412_v23  ;;  %v1433_v3 = vpack.c.bf16 %v1415_v41, %v1413_v17  ;;  %v1451_v17 = vld [vmem:[%s3250_s7 + $0x70] sm:$0xff] }
 0x413   : > { %1587 = vmatmul.bf16.gmra.mxu2 %v1432_v42  ;;  %1636 = vmatmul.bf16.gmra.mxu3 %v1433_v3 }
 0x414   : > { %v1568_v60 = vpop.f32.mrf.mxu2  ;;  %v1617_v47 = vpop.f32.mrf.mxu3 }
 0x415   : > { %v1569_v32 = vadd.f32 %v1568_v60, %v1441_v35  ;;  %v1452_v35 = vld [vmem:[%s3250_s7 + $0x78] sm:$0xff] }
 0x416   : > { %v2382_v2 = vpop.eup %2381 }
 0x417   : > { %v1618_v19 = vadd.f32 %v1617_v47, %v1569_v32  ;;  %v1371_v58 = vpop.xlane.xlu1 %1370  ;;  %v1416_v57 = vmul.f32 %v2382_v2, %v3227_v22  ;;  %v1417_v61 = vmul.f32 %v2382_v2, %v3229_v46 }
 0x418   : > { %2383 = vrcp.f32 %v1371_v58 }
 0x419   : > { %1651 = vst [vmem:[%s2777_s28 + $0x20] sm:$0xff] %v1618_v19 }
 0x41c   : > { %v1570_v15 = vpop.f32.mrf.mxu2  ;;  %v1619_v33 = vpop.f32.mrf.mxu3 }
 0x41d   : > { %v1571_v37 = vadd.f32 %v1570_v15, %v1442_v12 }
 0x41e   : > { %v2384_v38 = vpop.eup %2383 }
 0x41f   : > { %v1620_v34 = vadd.f32 %v1619_v33, %v1571_v37  ;;  %v1418_v59 = vmul.f32 %v2384_v38, %v3237_v51  ;;  %v1419_v1 = vmul.f32 %v2384_v38, %v3239_v52  ;;  %v1444_v51 = vld [vmem:[%s3250_s7 + $0x38] sm:$0xff] }
 0x421   : > { %1652 = vst [vmem:[%s2777_s28 + $0x28] sm:$0xff] %v1620_v34  ;;  %v1434_v4 = vpack.c.bf16 %v1418_v59, %v1416_v57  ;;  %v1435_v20 = vpack.c.bf16 %v1419_v1, %v1417_v61 }
 0x423   : > { %1592 = vmatmul.bf16.gmra.mxu2 %v1434_v4  ;;  %1641 = vmatmul.bf16.gmra.mxu3 %v1435_v20 }
 0x424   : > { %v1573_v25 = vpop.f32.mrf.mxu2  ;;  %v1622_v30 = vpop.f32.mrf.mxu3 }
 0x425   : > { %v1574_v22 = vadd.f32 %v1573_v25, %v1443_v36 }
 0x427   : > { %v1623_v43 = vadd.f32 %v1622_v30, %v1574_v22 }
 0x429   : > { %1653 = vst [vmem:[%s2777_s28 + $0x30] sm:$0xff] %v1623_v43 }
 0x42c   : > { %v1575_v16 = vpop.f32.mrf.mxu2  ;;  %v1624_v52 = vpop.f32.mrf.mxu3 }
 0x42d   : > { %v1576_v46 = vadd.f32 %v1575_v16, %v1444_v51 }
 0x42f   : > { %v1625_v28 = vadd.f32 %v1624_v52, %v1576_v46 }
 0x431   : > { %1654 = vst [vmem:[%s2777_s28 + $0x38] sm:$0xff] %v1625_v28 }
 0x476   : > { %v1578_v29 = vpop.f32.mrf.mxu2  ;;  %v1627_v27 = vpop.f32.mrf.mxu3 }
 0x477   : > { %v1579_v9 = vadd.f32 %v1578_v29, %v1445_v31 }
 0x479   : > { %v1628_v13 = vadd.f32 %v1627_v27, %v1579_v9 }
 0x47b   : > { %1655 = vst [vmem:[%s2777_s28 + $0x40] sm:$0xff] %v1628_v13 }
 0x47e   : > { %v1580_v21 = vpop.f32.mrf.mxu2  ;;  %v1629_v39 = vpop.f32.mrf.mxu3 }
 0x47f   : > { %v1581_v40 = vadd.f32 %v1580_v21, %v1446_v14 }
 0x481   : > { %v1630_v45 = vadd.f32 %v1629_v39, %v1581_v40 }
 0x483   : > { %1656 = vst [vmem:[%s2777_s28 + $0x48] sm:$0xff] %v1630_v45 }
 0x486   : > { %v1583_v53 = vpop.f32.mrf.mxu2  ;;  %v1632_v54 = vpop.f32.mrf.mxu3 }
 0x487   : > { %v1584_v48 = vadd.f32 %v1583_v53, %v1447_v50 }
 0x489   : > { %v1633_v7 = vadd.f32 %v1632_v54, %v1584_v48 }
 0x48b   : > { %1657 = vst [vmem:[%s2777_s28 + $0x50] sm:$0xff] %v1633_v7 }
 0x48e   : > { %v1585_v55 = vpop.f32.mrf.mxu2  ;;  %v1634_v62 = vpop.f32.mrf.mxu3 }
 0x48f   : > { %v1586_v10 = vadd.f32 %v1585_v55, %v1448_v24 }
 0x491   : > { %v1635_v0 = vadd.f32 %v1634_v62, %v1586_v10 }
 0x493   : > { %1658 = vst [vmem:[%s2777_s28 + $0x58] sm:$0xff] %v1635_v0 }
 0x496   : > { %v1588_v8 = vpop.f32.mrf.mxu2  ;;  %v1637_v5 = vpop.f32.mrf.mxu3 }
 0x497   : > { %v1589_v26 = vadd.f32 %v1588_v8, %v1449_v63 }
 0x499   : > { %v1638_v44 = vadd.f32 %v1637_v5, %v1589_v26 }
 0x49b   : > { %1659 = vst [vmem:[%s2777_s28 + $0x60] sm:$0xff] %v1638_v44 }
 0x49e   : > { %v1590_v18 = vpop.f32.mrf.mxu2  ;;  %v1639_v23 = vpop.f32.mrf.mxu3 }
 0x49f   : > { %v1591_v6 = vadd.f32 %v1590_v18, %v1450_v11 }
 0x4a1   : > { %v1640_v56 = vadd.f32 %v1639_v23, %v1591_v6 }
 0x4a3   : > { %1660 = vst [vmem:[%s2777_s28 + $0x68] sm:$0xff] %v1640_v56 }
 0x4a6   : > { %v1593_v41 = vpop.f32.mrf.mxu2  ;;  %v1642_v42 = vpop.f32.mrf.mxu3 }
 0x4a7   : > { %v1594_v3 = vadd.f32 %v1593_v41, %v1451_v17 }
 0x4a9   : > { %v1643_v49 = vadd.f32 %v1642_v42, %v1594_v3 }
 0x4ab   : > { %1661 = vst [vmem:[%s2777_s28 + $0x70] sm:$0xff] %v1643_v49 }
 0x4ae   : > { %v1595_v60 = vpop.f32.mrf.mxu2  ;;  %v1644_v32 = vpop.f32.mrf.mxu3 }
 0x4af   : > { %v1596_v47 = vadd.f32 %v1595_v60, %v1452_v35 }
 0x4b1   : > { %v1645_v19 = vadd.f32 %v1644_v32, %v1596_v47 }
 0x4b3   : > { %1662 = vst [vmem:[%s2777_s28 + $0x78] sm:$0xff] %v1645_v19 }
 0x4b4   : > { %2502 = shalt.err (!%p2499_p7)
}
 0x4b5   : > { %s2609_s12 = smov 128   ;;  %s2610_s28 = smov 8  }
 0x4b6   : > { %2170 = dma.vmem_to_hbm [thread:$0]  (%p2701_p6), %s1679_s2, 2048, %s1681_s18, %s1664_s19, %s2609_s12, %s2609_s12, %s2610_s28  }
 0x4b7 PF: > { %s3379_s7 = sld [smem:[#allocation13_spill]]  ;;  %p2192_p8 = scmp.ge.s32.totalorder %s2601_s22, 2 }
 0x4b9   : > { %p2184_p9 = pnand %p2192_p8, %p2707_p10 }
 0x4bb   : > { %p2185_p12 = pneg %p2184_p9 }
 0x4bd   : > { %s1695_s9 = sand.u32 1, %s3379_s7  }
 0x4be   : > { %s1696_s10 = scalar_lea.sflag [#allocation5], %s1695_s9 }
 0x4bf   : > { %2556 = dma.done.wait (%p2185_p12), %s1696_s10, 2048  }
 0x4c0   : > { %2558 = vsyncadd (%p2185_p12), %s1696_s10, 4294965248  ;;  %s20_s22 = sadd.s32 1, %s2601_s22   ;;  %s3381_s18 = sld [smem:[#allocation14_spill]] }
 0x4c1   : > { %p17_p13 = scmp.ge.s32.totalorder %s20_s22, 6   ;;  %s3382_s20 = sld [smem:[#allocation17_spill]] }
 0x4c2   : > { %s3383_s23 = sld [smem:[#allocation18_spill]]  ;;  %s3384_s12 = smov %s2565_s13 }
 0x4c3   : > { %s3385_s13 = smov %s2569_s14  ;;  %s3386_s14 = smov %s2752_s1 }
 0x4c4   : > { %s3387_s15 = smov %s2577_s16  ;;  %s3388_s16 = smov %s2581_s17 }
 0x4c5   : > { %s3389_s17 = smov %s2749_s24  ;;  %s3390_s19 = smov %s2597_s21 }
 0x4c6   :  { %19 = sbr.rel (!%p17_p13) target bundleno = 13 (0xd), region = 91 }
 0x4c8   : > { %s3391_s21 = smov %s3383_s23 }
 0x4cb   :  { %1702 = vsyncpa [#allocation4], 1 }
 0x4cc   :  { %1704 = vsyncpa [#allocation4 + $0x1], 1 }
 0x4cd   :  { %1705 = vsyncpa [#allocation7], 1 }
 0x4ce   :  { %1706 = vsyncpa [#allocation5], 1 }
 0x4cf   :  { %1708 = vsyncpa [#allocation5 + $0x1], 1 }

</bundles_post_ra>
